<compile_context>
chip_gen: v7x
topology: tpu7x:2x2x1
jax: 0.10.0
libtpu: 0.0.40
codegen_flags: <defaults>
</compile_context>

<pallas_src>
import functools

import jax
import jax.numpy as jnp
from jax.experimental import pallas as pl
from jax.experimental.pallas import tpu as pltpu

# ---- EDM hyper-parameters (module defaults) --------------------------------
SIGMA_DATA = 0.5
P_STD = 1.2
P_MEAN = -1.2

# ---- synthetic eps_model sizes ----------------------------------------------
C_IN = 4      # image channels
HID = 32      # hidden conv channels
TEMB = 16     # sinusoidal time-embedding dim


def _round_up(x, m):
    return (x + m - 1) // m * m


def _pick_row_stride(h, w):
    """Smallest row stride >= W+2 making the output width h*rs a 128-multiple."""
    base = w + 2
    for rs in range(base, base + 129):
        if (h * rs) % 128 == 0:
            return rs
    return base


# =============================================================================
# Fused EDM-denoise kernel: precondition + conv1(SiLU) + conv2 + combine
# =============================================================================
def _edm_fused_kernel(sigma_ref, x_ref, n_ref, mask_ref, w1_ref, b1_ref,
                      w2_ref, b2_ref, d_ref,
                      xin_scr, stack1, pad2, stack2,
                      *, lj, lj2, taps, cin, hid):
    """One image per grid step.

    Layout: images are zero-bordered and flattened with row stride rs
    (taps[t] = dy*rs + dx).  x_ref / n_ref hold the padded image starting at
    lane rs+1 (a zero left margin), so conv1 can be evaluated directly in
    conv2-input ("re-haloed") coordinates with lane-ALIGNED stores only.

    sigma_ref : (1, 1, 1) f32
    x_ref     : (1, Cin, PFX) f32   padded x,     image at lane offset rs+1
    n_ref     : (1, Cin, PFX) f32   padded noise, image at lane offset rs+1
    mask_ref  : (1, lj2)      f32   1.0 on valid (non-halo) conv2-input lanes
    w1_ref    : (HID, 9*Cin)  bf16  conv1 weights, K index = tap*Cin + cin
    b1_ref    : (1, HID, 1)   f32   conv1 bias + per-image time embedding
    w2_ref    : (Cin, 9*HID)  bf16  conv2 weights, K index = tap*HID + h
    b2_ref    : (Cin, 1)      f32
    d_ref     : (1, Cin, lj)  f32   D = c_skip*y + c_out*F  (row stride rs)
    """
    s = sigma_ref[0]                                        # (1, 1) f32
    x = x_ref[0]                                            # (Cin, PFX) f32
    n = n_ref[0]

    # ---- EDM preconditioning: y = x + n*sigma ; x_in = c_in * y (bf16) ----
    c_in = jax.lax.rsqrt(SIGMA_DATA * SIGMA_DATA + s * s)
    xin_scr[...] = ((x + n * s) * c_in).astype(xin_scr.dtype)

    # ---- conv1: im2col-in-VMEM + single MXU matmul (K = 9*Cin) ------------
    for t, off in enumerate(taps):                          # statically unrolled
        stack1[t * cin:(t + 1) * cin, :] = xin_scr[:, off:off + lj2]
    h = jnp.dot(w1_ref[...], stack1[...],
                preferred_element_type=jnp.float32)         # (HID, lj2) f32
    h = h + b1_ref[0]                                       # conv bias + t-emb
    h = h * jax.nn.sigmoid(h)                               # SiLU
    # Zero the halo / junk lanes and keep h resident as conv2's padded input.
    pad2[...] = (h * mask_ref[...]).astype(pad2.dtype)      # aligned full store

    # ---- conv2: im2col-in-VMEM + single MXU matmul (K = 9*HID) ------------
    for t, off in enumerate(taps):
        stack2[t * hid:(t + 1) * hid, :] = pad2[:, off:off + lj]
    f = jnp.dot(w2_ref[...], stack2[...],
                preferred_element_type=jnp.float32)         # (Cin, lj) f32
    f = f + b2_ref[...]                                     # (Cin, 1)

    # ---- EDM combine fused into the epilogue: D = c_skip*y + c_out*F ------
    denom = s * s + SIGMA_DATA * SIGMA_DATA
    c_skip = (SIGMA_DATA * SIGMA_DATA) / denom
    c_out = s * SIGMA_DATA * jax.lax.rsqrt(denom)
    yoff = taps[-1]                                         # = 2*rs + 2
    y = x[:, yoff:yoff + lj] + n[:, yoff:yoff + lj] * s     # recompute, no HBM
    d_ref[0] = (c_skip * y + c_out * f).astype(d_ref.dtype)


def _pad_to_layout(x4d, rs, m0, pfx):
    """(B, C, H, W) -> (B, C, PFX): zero border, row stride rs, image starts
    at lane offset m0, zero margin/tail elsewhere."""
    bsz, cc, hh, ww = x4d.shape
    xp = jnp.pad(x4d, ((0, 0), (0, 0), (1, 1), (1, rs - ww - 1)))
    flat = xp.reshape(bsz, cc, (hh + 2) * rs)
    return jnp.pad(flat, ((0, 0), (0, 0), (m0, pfx - m0 - (hh + 2) * rs)))


def edm_denoise_fused(params, x_nchw, sigma, noise):
    """Fully fused D(x + n*sigma, sigma) -> (B, C, H, W) f32."""
    B, C, H, W = x_nchw.shape
    rs = _pick_row_stride(H, W)              # 16x16 -> 24
    lj = H * rs                              # conv output width (multiple of 128)
    lj2 = _round_up((H + 2) * rs + 2, 128)   # conv2-input (re-haloed) width
    pfx = _round_up(lj2 + 2 * rs + 2, 128)   # conv1-input width incl. margins
    m0 = rs + 1                              # left margin so stores stay aligned
    taps = tuple(dy * rs + dx for dy in range(3) for dx in range(3))

    x_pad = _pad_to_layout(x_nchw, rs, m0, pfx)              # (B, C, PFX) f32
    n_pad = _pad_to_layout(noise, rs, m0, pfx)               # (B, C, PFX) f32

    # Validity mask for conv2-input lanes (zero border rows/cols + junk cols).
    q = jnp.arange(lj2, dtype=jnp.int32)
    row = q // rs
    col = q - row * rs
    mask = ((row >= 1) & (row <= H) & (col >= 1) & (col <= W))
    mask = mask.astype(jnp.float32).reshape(1, lj2)

    # Tiny time-MLP runs in plain XLA; its output folds into conv1's bias.
    h_t = _time_mlp(params, jnp.log(sigma) / 4.0)            # (B, HID)
    bias1 = (params["b1"][None, :] + h_t)[:, :, None]        # (B, HID, 1) f32
    bias2 = params["b2"].reshape(C_IN, 1)                    # (C, 1) f32

    kernel = functools.partial(_edm_fused_kernel, lj=lj, lj2=lj2, taps=taps,
                               cin=C_IN, hid=HID)

    flops = 2 * B * (HID * 9 * C_IN * lj2 + C_IN * 9 * HID * lj) \
        + 8 * B * C * pfx
    bytes_accessed = (x_pad.size + n_pad.size) * 4 + B * C * lj * 4 \
        + (params["w1"].size + params["w2"].size) * 2 + bias1.size * 4

    d = pl.pallas_call(
        kernel,
        out_shape=jax.ShapeDtypeStruct((B, C, lj), jnp.float32),
        grid=(B,),
        in_specs=[
            pl.BlockSpec((1, 1, 1), lambda b: (b, 0, 0)),       # sigma
            pl.BlockSpec((1, C, pfx), lambda b: (b, 0, 0)),     # x (padded)
            pl.BlockSpec((1, C, pfx), lambda b: (b, 0, 0)),     # noise (padded)
            pl.BlockSpec((1, lj2), lambda b: (0, 0)),           # mask (resident)
            pl.BlockSpec((HID, 9 * C_IN), lambda b: (0, 0)),    # w1 (resident)
            pl.BlockSpec((1, HID, 1), lambda b: (b, 0, 0)),     # bias1 + t-emb
            pl.BlockSpec((C_IN, 9 * HID), lambda b: (0, 0)),    # w2 (resident)
            pl.BlockSpec((C_IN, 1), lambda b: (0, 0)),          # bias2 (resident)
        ],
        out_specs=pl.BlockSpec((1, C, lj), lambda b: (b, 0, 0)),
        scratch_shapes=[
            pltpu.VMEM((C_IN, pfx), jnp.bfloat16),        # x_in (padded)
            pltpu.VMEM((9 * C_IN, lj2), jnp.bfloat16),    # conv1 im2col stack
            pltpu.VMEM((HID, lj2), jnp.bfloat16),         # re-haloed hidden act
            pltpu.VMEM((9 * HID, lj), jnp.bfloat16),      # conv2 im2col stack
        ],
        compiler_params=pltpu.CompilerParams(
            dimension_semantics=("parallel",)),
        cost_estimate=pl.CostEstimate(
            flops=flops, transcendentals=B * HID * lj2,
            bytes_accessed=bytes_accessed),
    )(sigma.reshape(B, 1, 1), x_pad, n_pad, mask,
      params["w1"], bias1, params["w2"], bias2)

    # Drop the rs-W junk columns per row (tiny XLA slice on the final output).
    return d.reshape(B, C, H, rs)[..., :W]


# =============================================================================
# Synthetic eps_model parameters + time MLP (tiny -> plain XLA)
# =============================================================================
def init_params(key):
    ks = jax.random.split(key, 4)

    def dense(k, shape, fan_in, dtype=jnp.float32):
        return (jax.random.normal(k, shape, jnp.float32)
                / jnp.sqrt(float(fan_in))).astype(dtype)

    return {
        "w_t1": dense(ks[0], (TEMB, HID), TEMB),
        "b_t1": jnp.zeros((HID,), jnp.float32),
        "w_t2": dense(ks[1], (HID, HID), HID),
        "b_t2": jnp.zeros((HID,), jnp.float32),
        # Conv weights stored once in the fused kernel's (Cout, 9*Cin) bf16
        # layout (K index = tap*Cin + cin, tap = dy*3 + dx): the im2col matmul
        # needs no per-call weight relayout.
        "w1": dense(ks[2], (HID, 9 * C_IN), 9 * C_IN, jnp.bfloat16),
        "b1": jnp.zeros((HID,), jnp.float32),
        "w2": dense(ks[3], (C_IN, 9 * HID), 9 * HID, jnp.bfloat16),
        "b2": jnp.zeros((C_IN,), jnp.float32),
    }


def _time_mlp(params, t):
    """(B,) c_noise -> (B, HID) conditioning; tiny, runs in plain XLA."""
    half = TEMB // 2
    freqs = jnp.exp(-jnp.log(10000.0)
                    * jnp.arange(half, dtype=jnp.float32) / half)
    ang = t[:, None] * freqs[None, :]
    emb = jnp.concatenate([jnp.sin(ang), jnp.cos(ang)], axis=-1)   # (B, TEMB)
    h = emb @ params["w_t1"] + params["b_t1"]
    h = h * jax.nn.sigmoid(h)
    return h @ params["w_t2"] + params["b_t2"]                     # (B, HID)


# =============================================================================
# EDM.forward
# =============================================================================
def _draw_sigma_noise(key, x):
    k_sig, k_noise = jax.random.split(key)
    rnd_normal = jax.random.normal(k_sig, (x.shape[0],), dtype=jnp.float32)
    sigma = jnp.exp(rnd_normal * P_STD + P_MEAN)
    noise = jax.random.normal(k_noise, x.shape, dtype=jnp.float32)
    return sigma, noise


def edm_forward(params, x_nchw, key):
    """Returns {'recon_dpm': D_yn (NCHW f32), 'weight_dpm': (B,)} like EDM.forward."""
    sigma, noise = _draw_sigma_noise(key, x_nchw)
    weight = (sigma ** 2 + SIGMA_DATA ** 2) / (sigma * SIGMA_DATA) ** 2
    d = edm_denoise_fused(params, x_nchw, sigma, noise)
    return {"recon_dpm": d, "weight_dpm": weight}


# =============================================================================
# Pure-XLA reference (same bf16-operand / f32-accumulation recipe)
# =============================================================================
def edm_forward_reference(params, x_nchw, key):
    B, C, Hh, Ww = x_nchw.shape
    sigma, noise = _draw_sigma_noise(key, x_nchw)
    weight = (sigma ** 2 + SIGMA_DATA ** 2) / (sigma * SIGMA_DATA) ** 2
    s = sigma.reshape(B, 1, 1, 1)
    y = x_nchw + noise * s
    x_in = (y * jax.lax.rsqrt(SIGMA_DATA ** 2 + s * s)).astype(jnp.bfloat16)

    h_t = _time_mlp(params, jnp.log(sigma) / 4.0)
    w1 = jnp.transpose(params["w1"].reshape(HID, 3, 3, C_IN), (1, 2, 3, 0))
    h = jax.lax.conv_general_dilated(
        x_in, w1, (1, 1), "SAME",
        dimension_numbers=("NCHW", "HWIO", "NCHW"),
        preferred_element_type=jnp.float32)
    h = h + params["b1"].reshape(1, HID, 1, 1) + h_t.reshape(B, HID, 1, 1)
    h = (h * jax.nn.sigmoid(h)).astype(jnp.bfloat16)
    w2 = jnp.transpose(params["w2"].reshape(C_IN, 3, 3, HID), (1, 2, 3, 0))
    f = jax.lax.conv_general_dilated(
        h, w2, (1, 1), "SAME",
        dimension_numbers=("NCHW", "HWIO", "NCHW"),
        preferred_element_type=jnp.float32)
    f = f + params["b2"].reshape(1, C, 1, 1)

    denom = s * s + SIGMA_DATA ** 2
    d = (SIGMA_DATA ** 2 / denom) * y \
        + (s * SIGMA_DATA * jax.lax.rsqrt(denom)) * f
    return {"recon_dpm": d, "weight_dpm": weight}


if __name__ == "__main__":
    key = jax.random.PRNGKey(0)
    k_x, k_fwd = jax.random.split(key)

    B, C, H, W = 2, C_IN, 16, 16
    x = jax.random.normal(k_x, (B, C, H, W), dtype=jnp.float32)
    params = init_params(jax.random.PRNGKey(42))

    out = jax.jit(edm_forward)(params, x, k_fwd)
    jax.block_until_ready(out)

    assert out["recon_dpm"].shape == (B, C, H, W)
    assert out["recon_dpm"].dtype == jnp.float32
    assert out["weight_dpm"].shape == (B,)
    assert bool(jnp.all(jnp.isfinite(out["recon_dpm"])))
    assert bool(jnp.all(out["weight_dpm"] > 0))

    ref = jax.jit(edm_forward_reference)(params, x, k_fwd)
    assert bool(jnp.allclose(out["weight_dpm"], ref["weight_dpm"],
                             rtol=1e-5, atol=1e-5))
    assert bool(jnp.allclose(out["recon_dpm"], ref["recon_dpm"],
                             rtol=5e-2, atol=5e-2))

    print("KERNEL_OK")
</pallas_src>

<mosaic_0001>
module attributes {stable_mosaic.version = 11 : i64} {
  func.func @_edm_fused_kernel(%arg0: i32, %arg1: memref<1x1x1xf32, #tpu.memory_space<vmem>>, %arg2: memref<1x4x640xf32, #tpu.memory_space<vmem>>, %arg3: memref<1x4x640xf32, #tpu.memory_space<vmem>>, %arg4: memref<1x512xf32, #tpu.memory_space<vmem>>, %arg5: memref<32x36xbf16, #tpu.memory_space<vmem>>, %arg6: memref<1x32x1xf32, #tpu.memory_space<vmem>>, %arg7: memref<4x288xbf16, #tpu.memory_space<vmem>>, %arg8: memref<4x1xf32, #tpu.memory_space<vmem>>, %arg9: memref<1x4x384xf32, #tpu.memory_space<vmem>>, %arg10: memref<4x640xbf16, #tpu.memory_space<vmem>>, %arg11: memref<36x512xbf16, #tpu.memory_space<vmem>>, %arg12: memref<32x512xbf16, #tpu.memory_space<vmem>>, %arg13: memref<288x384xbf16, #tpu.memory_space<vmem>>) attributes {dimension_semantics = [#tpu.dimension_semantics<parallel>], iteration_bounds = array<i64: 2>, scalar_prefetch = 0 : i64, scratch_operands = 4 : i64, tpu.core_type = #tpu.core_type<tc>, window_params = [{transform_indices = @transform_0, window_bounds = array<i64: 1, 1, 1>}, {transform_indices = @transform_1, window_bounds = array<i64: 1, 4, 640>}, {transform_indices = @transform_2, window_bounds = array<i64: 1, 4, 640>}, {pipeline_mode = #tpu.pipeline_mode<synchronous>, transform_indices = @transform_3, window_bounds = array<i64: 1, 512>}, {pipeline_mode = #tpu.pipeline_mode<synchronous>, transform_indices = @transform_4, window_bounds = array<i64: 32, 36>}, {transform_indices = @transform_5, window_bounds = array<i64: 1, 32, 1>}, {pipeline_mode = #tpu.pipeline_mode<synchronous>, transform_indices = @transform_6, window_bounds = array<i64: 4, 288>}, {pipeline_mode = #tpu.pipeline_mode<synchronous>, transform_indices = @transform_7, window_bounds = array<i64: 4, 1>}, {transform_indices = @transform_8, window_bounds = array<i64: 1, 4, 384>}]} {
    %c0 = arith.constant 0 : index
    %c0_0 = arith.constant 0 : index
    %c0_1 = arith.constant 0 : index
    %0 = vector.load %arg1[%c0, %c0_0, %c0_1] : memref<1x1x1xf32, #tpu.memory_space<vmem>>, vector<1x1x1xf32>
    %1 = vector.shape_cast %0 : vector<1x1x1xf32> to vector<1x1xf32>
    %c0_2 = arith.constant 0 : index
    %c0_3 = arith.constant 0 : index
    %c0_4 = arith.constant 0 : index
    %2 = vector.load %arg2[%c0_2, %c0_3, %c0_4] : memref<1x4x640xf32, #tpu.memory_space<vmem>>, vector<1x4x640xf32>
    %3 = vector.shape_cast %2 : vector<1x4x640xf32> to vector<4x640xf32>
    %c0_5 = arith.constant 0 : index
    %c0_6 = arith.constant 0 : index
    %c0_7 = arith.constant 0 : index
    %4 = vector.load %arg3[%c0_5, %c0_6, %c0_7] : memref<1x4x640xf32, #tpu.memory_space<vmem>>, vector<1x4x640xf32>
    %5 = vector.shape_cast %4 : vector<1x4x640xf32> to vector<4x640xf32>
    %6 = arith.mulf %1, %1 : vector<1x1xf32>
    %cst = arith.constant 2.500000e-01 : f32
    %7 = vector.broadcast %cst : f32 to vector<1x1xf32>
    %8 = arith.addf %7, %6 : vector<1x1xf32>
    %9 = math.rsqrt %8 : vector<1x1xf32>
    %10 = vector.broadcast %1 : vector<1x1xf32> to vector<4x640xf32>
    %11 = arith.mulf %5, %10 : vector<4x640xf32>
    %12 = arith.addf %3, %11 : vector<4x640xf32>
    %13 = vector.broadcast %9 : vector<1x1xf32> to vector<4x640xf32>
    %14 = arith.mulf %12, %13 : vector<4x640xf32>
    %15 = arith.truncf %14 : vector<4x640xf32> to vector<4x640xbf16>
    %c0_8 = arith.constant 0 : index
    %c0_9 = arith.constant 0 : index
    %16 = vector.load %arg10[%c0_8, %c0_9] : memref<4x640xbf16, #tpu.memory_space<vmem>>, vector<4x640xbf16>
    tpu.vector_store %arg10[%c0_8, %c0_9], %15 {strides = array<i32>} : memref<4x640xbf16, #tpu.memory_space<vmem>>, vector<4x640xbf16>,
    %c0_10 = arith.constant 0 : index
    %c0_11 = arith.constant 0 : index
    %17 = vector.load %arg10[%c0_10, %c0_11] : memref<4x640xbf16, #tpu.memory_space<vmem>>, vector<4x512xbf16>
    %c0_12 = arith.constant 0 : index
    %c0_13 = arith.constant 0 : index
    %18 = vector.load %arg11[%c0_12, %c0_13] : memref<36x512xbf16, #tpu.memory_space<vmem>>, vector<4x512xbf16>
    tpu.vector_store %arg11[%c0_12, %c0_13], %17 {strides = array<i32>} : memref<36x512xbf16, #tpu.memory_space<vmem>>, vector<4x512xbf16>,
    %c0_14 = arith.constant 0 : index
    %c1 = arith.constant 1 : index
    %19 = vector.load %arg10[%c0_14, %c1] : memref<4x640xbf16, #tpu.memory_space<vmem>>, vector<4x512xbf16>
    %c4 = arith.constant 4 : index
    %c0_15 = arith.constant 0 : index
    %20 = vector.load %arg11[%c4, %c0_15] : memref<36x512xbf16, #tpu.memory_space<vmem>>, vector<4x512xbf16>
    tpu.vector_store %arg11[%c4, %c0_15], %19 {strides = array<i32>} : memref<36x512xbf16, #tpu.memory_space<vmem>>, vector<4x512xbf16>,
    %c0_16 = arith.constant 0 : index
    %c2 = arith.constant 2 : index
    %21 = vector.load %arg10[%c0_16, %c2] : memref<4x640xbf16, #tpu.memory_space<vmem>>, vector<4x512xbf16>
    %c8 = arith.constant 8 : index
    %c0_17 = arith.constant 0 : index
    %22 = vector.load %arg11[%c8, %c0_17] : memref<36x512xbf16, #tpu.memory_space<vmem>>, vector<4x512xbf16>
    tpu.vector_store %arg11[%c8, %c0_17], %21 {strides = array<i32>} : memref<36x512xbf16, #tpu.memory_space<vmem>>, vector<4x512xbf16>,
    %c0_18 = arith.constant 0 : index
    %c24 = arith.constant 24 : index
    %23 = vector.load %arg10[%c0_18, %c24] : memref<4x640xbf16, #tpu.memory_space<vmem>>, vector<4x512xbf16>
    %c12 = arith.constant 12 : index
    %c0_19 = arith.constant 0 : index
    %24 = vector.load %arg11[%c12, %c0_19] : memref<36x512xbf16, #tpu.memory_space<vmem>>, vector<4x512xbf16>
    tpu.vector_store %arg11[%c12, %c0_19], %23 {strides = array<i32>} : memref<36x512xbf16, #tpu.memory_space<vmem>>, vector<4x512xbf16>,
    %c0_20 = arith.constant 0 : index
    %c25 = arith.constant 25 : index
    %25 = vector.load %arg10[%c0_20, %c25] : memref<4x640xbf16, #tpu.memory_space<vmem>>, vector<4x512xbf16>
    %c16 = arith.constant 16 : index
    %c0_21 = arith.constant 0 : index
    %26 = vector.load %arg11[%c16, %c0_21] : memref<36x512xbf16, #tpu.memory_space<vmem>>, vector<4x512xbf16>
    tpu.vector_store %arg11[%c16, %c0_21], %25 {strides = array<i32>} : memref<36x512xbf16, #tpu.memory_space<vmem>>, vector<4x512xbf16>,
    %c0_22 = arith.constant 0 : index
    %c26 = arith.constant 26 : index
    %27 = vector.load %arg10[%c0_22, %c26] : memref<4x640xbf16, #tpu.memory_space<vmem>>, vector<4x512xbf16>
    %c20 = arith.constant 20 : index
    %c0_23 = arith.constant 0 : index
    %28 = vector.load %arg11[%c20, %c0_23] : memref<36x512xbf16, #tpu.memory_space<vmem>>, vector<4x512xbf16>
    tpu.vector_store %arg11[%c20, %c0_23], %27 {strides = array<i32>} : memref<36x512xbf16, #tpu.memory_space<vmem>>, vector<4x512xbf16>,
    %c0_24 = arith.constant 0 : index
    %c48 = arith.constant 48 : index
    %29 = vector.load %arg10[%c0_24, %c48] : memref<4x640xbf16, #tpu.memory_space<vmem>>, vector<4x512xbf16>
    %c24_25 = arith.constant 24 : index
    %c0_26 = arith.constant 0 : index
    %30 = vector.load %arg11[%c24_25, %c0_26] : memref<36x512xbf16, #tpu.memory_space<vmem>>, vector<4x512xbf16>
    tpu.vector_store %arg11[%c24_25, %c0_26], %29 {strides = array<i32>} : memref<36x512xbf16, #tpu.memory_space<vmem>>, vector<4x512xbf16>,
    %c0_27 = arith.constant 0 : index
    %c49 = arith.constant 49 : index
    %31 = vector.load %arg10[%c0_27, %c49] : memref<4x640xbf16, #tpu.memory_space<vmem>>, vector<4x512xbf16>
    %c28 = arith.constant 28 : index
    %c0_28 = arith.constant 0 : index
    %32 = vector.load %arg11[%c28, %c0_28] : memref<36x512xbf16, #tpu.memory_space<vmem>>, vector<4x512xbf16>
    tpu.vector_store %arg11[%c28, %c0_28], %31 {strides = array<i32>} : memref<36x512xbf16, #tpu.memory_space<vmem>>, vector<4x512xbf16>,
    %c0_29 = arith.constant 0 : index
    %c50 = arith.constant 50 : index
    %33 = vector.load %arg10[%c0_29, %c50] : memref<4x640xbf16, #tpu.memory_space<vmem>>, vector<4x512xbf16>
    %c32 = arith.constant 32 : index
    %c0_30 = arith.constant 0 : index
    %34 = vector.load %arg11[%c32, %c0_30] : memref<36x512xbf16, #tpu.memory_space<vmem>>, vector<4x512xbf16>
    tpu.vector_store %arg11[%c32, %c0_30], %33 {strides = array<i32>} : memref<36x512xbf16, #tpu.memory_space<vmem>>, vector<4x512xbf16>,
    %c0_31 = arith.constant 0 : index
    %c0_32 = arith.constant 0 : index
    %35 = vector.load %arg5[%c0_31, %c0_32] : memref<32x36xbf16, #tpu.memory_space<vmem>>, vector<32x36xbf16>
    %c0_33 = arith.constant 0 : index
    %c0_34 = arith.constant 0 : index
    %36 = vector.load %arg11[%c0_33, %c0_34] : memref<36x512xbf16, #tpu.memory_space<vmem>>, vector<36x512xbf16>
    %cst_35 = arith.constant dense<0.000000e+00> : vector<32x512xf32>
    %37 = tpu.matmul %35, %36, %cst_35 {dimension_numbers = #tpu.dot_dimension_numbers<[1], [0], [0], [1], [0, 0, 1, 1], [], []>} : vector<32x36xbf16>, vector<36x512xbf16>, vector<32x512xf32> -> vector<32x512xf32>
    %c0_36 = arith.constant 0 : index
    %c0_37 = arith.constant 0 : index
    %c0_38 = arith.constant 0 : index
    %38 = vector.load %arg6[%c0_36, %c0_37, %c0_38] : memref<1x32x1xf32, #tpu.memory_space<vmem>>, vector<1x32x1xf32>
    %39 = vector.shape_cast %38 : vector<1x32x1xf32> to vector<32x1xf32>
    %40 = vector.broadcast %39 : vector<32x1xf32> to vector<32x512xf32>
    %41 = arith.addf %37, %40 : vector<32x512xf32>
    %42 = arith.negf %41 : vector<32x512xf32>
    %43 = math.exp %42 : vector<32x512xf32>
    %cst_39 = arith.constant 1.000000e+00 : f32
    %44 = vector.broadcast %cst_39 : f32 to vector<32x512xf32>
    %45 = arith.addf %44, %43 : vector<32x512xf32>
    %46 = arith.divf %44, %45 : vector<32x512xf32>
    %47 = arith.mulf %41, %46 : vector<32x512xf32>
    %c0_40 = arith.constant 0 : index
    %c0_41 = arith.constant 0 : index
    %48 = vector.load %arg4[%c0_40, %c0_41] : memref<1x512xf32, #tpu.memory_space<vmem>>, vector<1x512xf32>
    %49 = vector.broadcast %48 : vector<1x512xf32> to vector<32x512xf32>
    %50 = arith.mulf %47, %49 : vector<32x512xf32>
    %51 = arith.truncf %50 : vector<32x512xf32> to vector<32x512xbf16>
    %c0_42 = arith.constant 0 : index
    %c0_43 = arith.constant 0 : index
    %52 = vector.load %arg12[%c0_42, %c0_43] : memref<32x512xbf16, #tpu.memory_space<vmem>>, vector<32x512xbf16>
    tpu.vector_store %arg12[%c0_42, %c0_43], %51 {strides = array<i32>} : memref<32x512xbf16, #tpu.memory_space<vmem>>, vector<32x512xbf16>,
    %c0_44 = arith.constant 0 : index
    %c0_45 = arith.constant 0 : index
    %53 = vector.load %arg12[%c0_44, %c0_45] : memref<32x512xbf16, #tpu.memory_space<vmem>>, vector<32x384xbf16>
    %c0_46 = arith.constant 0 : index
    %c0_47 = arith.constant 0 : index
    %54 = vector.load %arg13[%c0_46, %c0_47] : memref<288x384xbf16, #tpu.memory_space<vmem>>, vector<32x384xbf16>
    tpu.vector_store %arg13[%c0_46, %c0_47], %53 {strides = array<i32>} : memref<288x384xbf16, #tpu.memory_space<vmem>>, vector<32x384xbf16>,
    %c0_48 = arith.constant 0 : index
    %c1_49 = arith.constant 1 : index
    %55 = vector.load %arg12[%c0_48, %c1_49] : memref<32x512xbf16, #tpu.memory_space<vmem>>, vector<32x384xbf16>
    %c32_50 = arith.constant 32 : index
    %c0_51 = arith.constant 0 : index
    %56 = vector.load %arg13[%c32_50, %c0_51] : memref<288x384xbf16, #tpu.memory_space<vmem>>, vector<32x384xbf16>
    tpu.vector_store %arg13[%c32_50, %c0_51], %55 {strides = array<i32>} : memref<288x384xbf16, #tpu.memory_space<vmem>>, vector<32x384xbf16>,
    %c0_52 = arith.constant 0 : index
    %c2_53 = arith.constant 2 : index
    %57 = vector.load %arg12[%c0_52, %c2_53] : memref<32x512xbf16, #tpu.memory_space<vmem>>, vector<32x384xbf16>
    %c64 = arith.constant 64 : index
    %c0_54 = arith.constant 0 : index
    %58 = vector.load %arg13[%c64, %c0_54] : memref<288x384xbf16, #tpu.memory_space<vmem>>, vector<32x384xbf16>
    tpu.vector_store %arg13[%c64, %c0_54], %57 {strides = array<i32>} : memref<288x384xbf16, #tpu.memory_space<vmem>>, vector<32x384xbf16>,
    %c0_55 = arith.constant 0 : index
    %c24_56 = arith.constant 24 : index
    %59 = vector.load %arg12[%c0_55, %c24_56] : memref<32x512xbf16, #tpu.memory_space<vmem>>, vector<32x384xbf16>
    %c96 = arith.constant 96 : index
    %c0_57 = arith.constant 0 : index
    %60 = vector.load %arg13[%c96, %c0_57] : memref<288x384xbf16, #tpu.memory_space<vmem>>, vector<32x384xbf16>
    tpu.vector_store %arg13[%c96, %c0_57], %59 {strides = array<i32>} : memref<288x384xbf16, #tpu.memory_space<vmem>>, vector<32x384xbf16>,
    %c0_58 = arith.constant 0 : index
    %c25_59 = arith.constant 25 : index
    %61 = vector.load %arg12[%c0_58, %c25_59] : memref<32x512xbf16, #tpu.memory_space<vmem>>, vector<32x384xbf16>
    %c128 = arith.constant 128 : index
    %c0_60 = arith.constant 0 : index
    %62 = vector.load %arg13[%c128, %c0_60] : memref<288x384xbf16, #tpu.memory_space<vmem>>, vector<32x384xbf16>
    tpu.vector_store %arg13[%c128, %c0_60], %61 {strides = array<i32>} : memref<288x384xbf16, #tpu.memory_space<vmem>>, vector<32x384xbf16>,
    %c0_61 = arith.constant 0 : index
    %c26_62 = arith.constant 26 : index
    %63 = vector.load %arg12[%c0_61, %c26_62] : memref<32x512xbf16, #tpu.memory_space<vmem>>, vector<32x384xbf16>
    %c160 = arith.constant 160 : index
    %c0_63 = arith.constant 0 : index
    %64 = vector.load %arg13[%c160, %c0_63] : memref<288x384xbf16, #tpu.memory_space<vmem>>, vector<32x384xbf16>
    tpu.vector_store %arg13[%c160, %c0_63], %63 {strides = array<i32>} : memref<288x384xbf16, #tpu.memory_space<vmem>>, vector<32x384xbf16>,
    %c0_64 = arith.constant 0 : index
    %c48_65 = arith.constant 48 : index
    %65 = vector.load %arg12[%c0_64, %c48_65] : memref<32x512xbf16, #tpu.memory_space<vmem>>, vector<32x384xbf16>
    %c192 = arith.constant 192 : index
    %c0_66 = arith.constant 0 : index
    %66 = vector.load %arg13[%c192, %c0_66] : memref<288x384xbf16, #tpu.memory_space<vmem>>, vector<32x384xbf16>
    tpu.vector_store %arg13[%c192, %c0_66], %65 {strides = array<i32>} : memref<288x384xbf16, #tpu.memory_space<vmem>>, vector<32x384xbf16>,
    %c0_67 = arith.constant 0 : index
    %c49_68 = arith.constant 49 : index
    %67 = vector.load %arg12[%c0_67, %c49_68] : memref<32x512xbf16, #tpu.memory_space<vmem>>, vector<32x384xbf16>
    %c224 = arith.constant 224 : index
    %c0_69 = arith.constant 0 : index
    %68 = vector.load %arg13[%c224, %c0_69] : memref<288x384xbf16, #tpu.memory_space<vmem>>, vector<32x384xbf16>
    tpu.vector_store %arg13[%c224, %c0_69], %67 {strides = array<i32>} : memref<288x384xbf16, #tpu.memory_space<vmem>>, vector<32x384xbf16>,
    %c0_70 = arith.constant 0 : index
    %c50_71 = arith.constant 50 : index
    %69 = vector.load %arg12[%c0_70, %c50_71] : memref<32x512xbf16, #tpu.memory_space<vmem>>, vector<32x384xbf16>
    %c256 = arith.constant 256 : index
    %c0_72 = arith.constant 0 : index
    %70 = vector.load %arg13[%c256, %c0_72] : memref<288x384xbf16, #tpu.memory_space<vmem>>, vector<32x384xbf16>
    tpu.vector_store %arg13[%c256, %c0_72], %69 {strides = array<i32>} : memref<288x384xbf16, #tpu.memory_space<vmem>>, vector<32x384xbf16>,
    %c0_73 = arith.constant 0 : index
    %c0_74 = arith.constant 0 : index
    %71 = vector.load %arg7[%c0_73, %c0_74] : memref<4x288xbf16, #tpu.memory_space<vmem>>, vector<4x288xbf16>
    %c0_75 = arith.constant 0 : index
    %c0_76 = arith.constant 0 : index
    %72 = vector.load %arg13[%c0_75, %c0_76] : memref<288x384xbf16, #tpu.memory_space<vmem>>, vector<288x384xbf16>
    %cst_77 = arith.constant dense<0.000000e+00> : vector<4x384xf32>
    %73 = tpu.matmul %71, %72, %cst_77 {dimension_numbers = #tpu.dot_dimension_numbers<[1], [0], [0], [1], [0, 0, 1, 1], [], []>} : vector<4x288xbf16>, vector<288x384xbf16>, vector<4x384xf32> -> vector<4x384xf32>
    %c0_78 = arith.constant 0 : index
    %c0_79 = arith.constant 0 : index
    %74 = vector.load %arg8[%c0_78, %c0_79] : memref<4x1xf32, #tpu.memory_space<vmem>>, vector<4x1xf32>
    %75 = vector.broadcast %74 : vector<4x1xf32> to vector<4x384xf32>
    %76 = arith.addf %73, %75 : vector<4x384xf32>
    %77 = arith.mulf %1, %1 : vector<1x1xf32>
    %cst_80 = arith.constant 2.500000e-01 : f32
    %78 = vector.broadcast %cst_80 : f32 to vector<1x1xf32>
    %79 = arith.addf %77, %78 : vector<1x1xf32>
    %cst_81 = arith.constant 2.500000e-01 : f32
    %80 = vector.broadcast %cst_81 : f32 to vector<1x1xf32>
    %81 = arith.divf %80, %79 : vector<1x1xf32>
    %cst_82 = arith.constant 5.000000e-01 : f32
    %82 = vector.broadcast %cst_82 : f32 to vector<1x1xf32>
    %83 = arith.mulf %1, %82 : vector<1x1xf32>
    %84 = math.rsqrt %79 : vector<1x1xf32>
    %85 = arith.mulf %83, %84 : vector<1x1xf32>
    %86 = vector.extract_strided_slice %3 {offsets = [0, 50], sizes = [4, 384], strides = [1, 1]} : vector<4x640xf32> to vector<4x384xf32>
    %87 = vector.extract_strided_slice %5 {offsets = [0, 50], sizes = [4, 384], strides = [1, 1]} : vector<4x640xf32> to vector<4x384xf32>
    %88 = vector.broadcast %1 : vector<1x1xf32> to vector<4x384xf32>
    %89 = arith.mulf %87, %88 : vector<4x384xf32>
    %90 = arith.addf %86, %89 : vector<4x384xf32>
    %91 = vector.broadcast %81 : vector<1x1xf32> to vector<4x384xf32>
    %92 = arith.mulf %91, %90 : vector<4x384xf32>
    %93 = vector.broadcast %85 : vector<1x1xf32> to vector<4x384xf32>
    %94 = arith.mulf %93, %76 : vector<4x384xf32>
    %95 = arith.addf %92, %94 : vector<4x384xf32>
    %c0_83 = arith.constant 0 : index
    %c0_84 = arith.constant 0 : index
    %c0_85 = arith.constant 0 : index
    %96 = vector.load %arg9[%c0_83, %c0_84, %c0_85] : memref<1x4x384xf32, #tpu.memory_space<vmem>>, vector<1x4x384xf32>
    %97 = vector.shape_cast %96 : vector<1x4x384xf32> to vector<4x384xf32>
    %98 = vector.shape_cast %95 : vector<4x384xf32> to vector<1x4x384xf32>
    tpu.vector_store %arg9[%c0_83, %c0_84, %c0_85], %98 {strides = array<i32>} : memref<1x4x384xf32, #tpu.memory_space<vmem>>, vector<1x4x384xf32>,
    return
  }
  func.func @transform_0(%arg0: i32) -> (i32, i32, i32) {
    %c0_i32 = arith.constant 0 : i32
    %c0_i32_0 = arith.constant 0 : i32
    %c0_i32_1 = arith.constant 0 : i32
    return %arg0, %c0_i32, %c0_i32_0 : i32, i32, i32
  }
  func.func @transform_1(%arg0: i32) -> (i32, i32, i32) {
    %c0_i32 = arith.constant 0 : i32
    %c0_i32_0 = arith.constant 0 : i32
    %c0_i32_1 = arith.constant 0 : i32
    return %arg0, %c0_i32, %c0_i32_0 : i32, i32, i32
  }
  func.func @transform_2(%arg0: i32) -> (i32, i32, i32) {
    %c0_i32 = arith.constant 0 : i32
    %c0_i32_0 = arith.constant 0 : i32
    %c0_i32_1 = arith.constant 0 : i32
    return %arg0, %c0_i32, %c0_i32_0 : i32, i32, i32
  }
  func.func @transform_3(%arg0: i32) -> (i32, i32) {
    %c0_i32 = arith.constant 0 : i32
    %c0_i32_0 = arith.constant 0 : i32
    %c0_i32_1 = arith.constant 0 : i32
    return %c0_i32, %c0_i32_0 : i32, i32
  }
  func.func @transform_4(%arg0: i32) -> (i32, i32) {
    %c0_i32 = arith.constant 0 : i32
    %c0_i32_0 = arith.constant 0 : i32
    %c0_i32_1 = arith.constant 0 : i32
    return %c0_i32, %c0_i32_0 : i32, i32
  }
  func.func @transform_5(%arg0: i32) -> (i32, i32, i32) {
    %c0_i32 = arith.constant 0 : i32
    %c0_i32_0 = arith.constant 0 : i32
    %c0_i32_1 = arith.constant 0 : i32
    return %arg0, %c0_i32, %c0_i32_0 : i32, i32, i32
  }
  func.func @transform_6(%arg0: i32) -> (i32, i32) {
    %c0_i32 = arith.constant 0 : i32
    %c0_i32_0 = arith.constant 0 : i32
    %c0_i32_1 = arith.constant 0 : i32
    return %c0_i32, %c0_i32_0 : i32, i32
  }
  func.func @transform_7(%arg0: i32) -> (i32, i32) {
    %c0_i32 = arith.constant 0 : i32
    %c0_i32_0 = arith.constant 0 : i32
    %c0_i32_1 = arith.constant 0 : i32
    return %c0_i32, %c0_i32_0 : i32, i32
  }
  func.func @transform_8(%arg0: i32) -> (i32, i32, i32) {
    %c0_i32 = arith.constant 0 : i32
    %c0_i32_0 = arith.constant 0 : i32
    %c0_i32_1 = arith.constant 0 : i32
    return %arg0, %c0_i32, %c0_i32_0 : i32, i32, i32
  }
}

</mosaic_0001>

<bundles_post_ra>
// kernel: edm_forward.1
= control target key start
LH: loop header
LB: loop body
LE: loop exit
PB: predicated region body
PF: predicated region fallthrough
CT: control target
= control target key end

     0   :  { %s2301_s27 = smov 0   ;;  %s2877_s0 = inlined_call_operand.vmem [shape: f32[2,1,1], index: 0, kind: input, shape index: {}]   ;;  %s2878_s1 = inlined_call_operand.vmem [shape: f32[2,4,640], index: 1, kind: input, shape index: {}]   ;;  %s2879_s2 = inlined_call_operand.vmem [shape: f32[2,4,640], index: 2, kind: input, shape index: {}]   ;;  %s2880_s3 = inlined_call_operand.vmem [shape: f32[1,512], index: 3, kind: input, shape index: {}]   ;;  %s2881_s4 = inlined_call_operand.vmem [shape: bf16[32,36], index: 4, kind: input, shape index: {}]   ;;  %s2882_s5 = inlined_call_operand.vmem [shape: f32[2,32,1], index: 5, kind: input, shape index: {}]   ;;  %s2883_s6 = inlined_call_operand.vmem [shape: bf16[4,288], index: 6, kind: input, shape index: {}]   ;;  %s2884_s7 = inlined_call_operand.vmem [shape: f32[4,1], index: 7, kind: input, shape index: {}]   ;;  %s2885_s8 = inlined_call_operand.vmem [shape: f32[2,4,384], index: 8, kind: output, shape index: {}]  }
   0x1 LB: > { %s2018_s28 = sadd.s32 4294967295, %s2241_s27   ;;  %p2022_p0 = scmp.ge.s32.totalorder %s2241_s27, 1  ;;  %s2241_s27 = sphi %s2301_s27, %s18_s27  }
   0x2   : > { %p290_p1 = scmp.lt.s32.totalorder %s2241_s27, 3 }
   0x4   : > { %p291_p2 = pnand %p2022_p0, %p290_p1 }
   0x5   : > { %p337_p3 = scmp.lt.s32.totalorder (!%p291_p2), %s2018_s28, 1  ;;  %v372_v0 = vlaneseq (!%p291_p2)  ;;  %v2243_v1 = vmov (!%p291_p2), 0   ;;  %v2244_v20 = vmov (!%p291_p2), 1983009808   ;;  %s2245_s17 = smov (!%p291_p2), 126   ;;  %vm499_vm0 = vcmask (!%p291_p2), 1043456  }
   0x6   : > { %294 = sbr.rel (%p291_p2) target bundleno = 1289 (0x509), region = 52  ;;  %2140 = vset.pattern.permute.xlu0 (!%p291_p2), %v2243_v1  ;;  %970 = vmatprep.mubr.bf16.mxu1 (!%p291_p2), %v2243_v1  ;;  %v417_v21 = vunpack.c.l.s4 (!%p291_p2), %v2244_v20  ;;  %s2246_s18 = smov (!%p291_p2), 127   ;;  %vm590_vm1 = vcmask (!%p291_p2), 850944   ;;  %vm501_vm2 = vcmask (!%p291_p2), 1039360   ;;  %vm679_vm3 = vcmask (!%p291_p2), 834560  }
   0x7   : > { %v2313_v2 = vshrl.u32 (!%p291_p2), %v372_v0, 7  ;;  %2141 = vset.pattern.permute.xlu1 (!%p291_p2), %v2243_v1  ;;  %s2247_s19 = smov (!%p291_p2), 103   ;;  %s2248_s20 = smov (!%p291_p2), 104   ;;  %vm545_vm4 = vcmask (!%p291_p2), 1031168   ;;  %vm768_vm5 = vcmask (!%p291_p2), 646144   ;;  %vm634_vm6 = vcmask (!%p291_p2), 842752  }
   0x8   : > { %v418_v25 = vunpack.c.0.s8 (!%p291_p2), %v417_v21  ;;  %s2249_s21 = smov (!%p291_p2), 80   ;;  %s2250_s22 = smov (!%p291_p2), 102   ;;  %vm723_vm7 = vcmask (!%p291_p2), 654336   ;;  %vm812_vm8 = vcmask (!%p291_p2), 637952   ;;  %vm925_vm9 = vcmask (!%p291_p2), 1041408  }
   0x9   : > { %v2321_v3 = vsub.s32 (!%p291_p2), 0, %v2313_v2  ;;  %s2251_s23 = smov (!%p291_p2), 78   ;;  %s2252_s24 = smov (!%p291_p2), 79   ;;  %vm918_vm10 = vcmask (!%p291_p2), 293888   ;;  %vm2254_vm11 = vmmov (!%p291_p2), 0   ;;  %vm1702_vm12 = vcmask (!%p291_p2), 261120  }
   0xa   : > { %v2350_v30 = vsub.s32 (!%p291_p2), %v418_v25, %v2313_v2  ;;  %vm1905_vm13 = vcmask (!%p291_p2), 408576  }
   0xd   : > { %s2887_s28 = smov (!%p337_p3, %s2018_s28), 1 }
   0xe   : > { %s339_s9 = scalar_lea.vmem %s2877_s0, %s2887_s28  ;;  %s2117_s10 = smul.u32 20, %s2887_s28 }
   0xf   : > { %v2323_v4 = vld [vmem:[%s339_s9] sm:$0x1]  ;;  %s2077_s25 = sshll.u32 %s2887_s28, 5 }
  0x10   : > { %v375_v5 = vrot.slane %v2323_v4, %v2321_v3  ;;  %v368_v6 = vmul.f32 %v2323_v4, %v2323_v4  ;;  %s349_s13 = scalar_lea.vmem %s2879_s2, %s2117_s10  ;;  %s344_s16 = scalar_lea.vmem %s2878_s1, %s2117_s10 }
  0x11   : > { %v365_v10 = vld [vmem:[%s349_s13] sm:$0xff]  ;;  %v366_v11 = vld [vmem:[%s349_s13 + $0x8] sm:$0xff]  ;;  %v367_v12 = vld [vmem:[%s349_s13 + $0x10] sm:$0xf]  ;;  %s354_s30 = scalar_lea.vmem %s2882_s5, %s2077_s25 }
  0x12   : > { %377 = vperm.xlu0 %2140, %v375_v5   ;;  %v2329_v7 = vadd.f32 0.25, %v368_v6  ;;  %v362_v17 = vld [vmem:[%s344_s16] sm:$0xff]  ;;  %v363_v18 = vld [vmem:[%s344_s16 + $0x8] sm:$0xff]  ;;  %v364_v19 = vld [vmem:[%s344_s16 + $0x10] sm:$0xf] }
  0x13   : > { %v834_v53 = vld [vmem:[%s354_s30] sm:$0xff]  ;;  %v836_v54 = vld [vmem:[%s354_s30 + $0x10] sm:$0xff]  ;;  %v835_v55 = vld [vmem:[%s354_s30 + $0x8] sm:$0xff] }
  0x14   : > { %2165 = vrsqrt.f32 %v2329_v7  ;;  %v837_v56 = vld [vmem:[%s354_s30 + $0x18] sm:$0xff] }
  0x1e   : > { %v2332_v8 = vpop.eup %2165 }
  0x1f   : > { %v390_v9 = vrot.slane %v2332_v8, %v2321_v3 }
  0x21   : > { %392 = vperm.xlu0 %2140, %v390_v9  }
  0x91   : > { %v378_v13 = vpop.permute.xlu0 %377 }
  0x92   : > { %v380_v14 = vmul.f32 %v378_v13, %v365_v10  ;;  %v381_v15 = vmul.f32 %v378_v13, %v366_v11  ;;  %v382_v16 = vmul.f32 %v378_v13, %v367_v12 }
  0x94   : > { %v2343_v22 = vadd.f32 %v380_v14, %v362_v17  ;;  %v2345_v23 = vadd.f32 %v381_v15, %v363_v18  ;;  %v385_v24 = vadd.f32 %v382_v16, %v364_v19 }
  0xa0   : > { %v393_v26 = vpop.permute.xlu0 %392 }
  0xa1   : > { %v395_v27 = vmul.f32 %v393_v26, %v2343_v22  ;;  %v396_v28 = vmul.f32 %v393_v26, %v2345_v23  ;;  %v397_v29 = vmul.f32 %v393_v26, %v385_v24 }
  0xa3   : > { %v400_v31 = vcombine.high %v395_v27, %v395_v27  ;;  %v401_v32 = vcombine.high %v396_v28, %v396_v28  ;;  %v408_v33 = vpack.c.bf16 %v397_v29, %v397_v29 }
  0xa5   : > { %v2028_v34 = vpack.c.bf16 %v400_v31, %v395_v27  ;;  %v2029_v35 = vpack.c.bf16 %v401_v32, %v396_v28  ;;  %2030 = vst.sshfl [vmem:[#allocation2 + $0x8] sm:$0x3 pattern:$0x76325410] %v408_v33 }
  0xa7   : > { %v422_v36 = vrot.slane %v2028_v34, %v2350_v30  ;;  %v429_v37 = vrot.slane %v2029_v35, %v2350_v30 }
  0xa9   : > { %v430_v38 = vcombine.low %v422_v36, %v429_v37  ;;  %v2233_v40 = vcombine.low %v429_v37, %v429_v37  ;;  %v2234_v41 = vcombine.low %v422_v36, %v422_v36 }
  0xab   : > { %v520_v39 = vrot.slane %v430_v38, %v2350_v30  ;;  %2031 = vst.sshfl [vmem:[#allocation3] sm:$0xf pattern:$0x76325410] %v430_v38  ;;  %v564_v42 = vrot.slane %v2234_v41, %v2350_v30  ;;  %v527_v43 = vrot.slane %v2233_v40, %v2350_v30 }
  0xac   : > { %2032 = vst.sshfl [vmem:[#allocation3 + $0x8] sm:$0xf pattern:$0x76325410] %v2233_v40 }
  0xad   : > { %535 = vrot.lane.b32.xlu0 %v520_v39, %s2245_s17  ;;  %492 = vrot.lane.b32.xlu1 %v520_v39, %s2246_s18  ;;  %v2142_v44 = vld [vmem:[#allocation2 + $0x8] ss:$0 sps:$4 sm:$0x33]  }
  0xae   : > { %v489_v45 = vrot.slane %v2142_v44, %v2350_v30  ;;  %v2143_v46 = vld [vmem:[#allocation2 + $0x8] ss:$0 sps:$4 sm:$0x33]  }
  0xaf   : > { %v579_v47 = vrot.slane %v2143_v46, %v2350_v30  ;;  %v2144_v48 = vld [vmem:[#allocation2 + $0x8] ss:$0 sps:$4 sm:$0x33]  }
  0xb0   : > { %v668_v49 = vrot.slane %v2144_v48, %v2350_v30  ;;  %v2145_v50 = vld [vmem:[#allocation2 + $0x8] ss:$0 sps:$4 sm:$0x33]  }
  0xb1   : > { %624 = vrot.lane.b32.xlu0 %v520_v39, %s2247_s19  ;;  %582 = vrot.lane.b32.xlu1 %v520_v39, %s2248_s20  ;;  %v2033_v51 = vld.sshfl [vmem:[#allocation2 + $0x8] sm:$0x3 pattern:$0x76325410]  ;;  %v757_v52 = vrot.slane %v2145_v50, %v2350_v30 }
  0xb5   : > { %713 = vrot.lane.b32.xlu0 %v520_v39, %s2249_s21  ;;  %671 = vrot.lane.b32.xlu1 %v520_v39, %s2250_s22 }
  0xb9   : > { %802 = vrot.lane.b32.xlu0 %v520_v39, %s2251_s23  ;;  %760 = vrot.lane.b32.xlu1 %v520_v39, %s2252_s24 }
  0xbd   : > { %580 = vrot.lane.b32.xlu0 %v564_v42, %s2248_s20  ;;  %490 = vrot.lane.b32.xlu1 %v564_v42, %s2246_s18 }
  0xc1   : > { %669 = vrot.lane.b32.xlu0 %v564_v42, %s2250_s22  ;;  %537 = vrot.lane.b32.xlu1 %v527_v43, %s2245_s17 }
  0xc5   : > { %758 = vrot.lane.b32.xlu0 %v564_v42, %s2252_s24  ;;  %626 = vrot.lane.b32.xlu1 %v527_v43, %s2247_s19 }
  0xc9   : > { %494 = vrot.lane.b32.xlu0 %v489_v45, %s2246_s18  ;;  %715 = vrot.lane.b32.xlu1 %v527_v43, %s2249_s21 }
  0xcd   : > { %584 = vrot.lane.b32.xlu0 %v579_v47, %s2248_s20  ;;  %804 = vrot.lane.b32.xlu1 %v527_v43, %s2251_s23 }
  0xd1   : > { %673 = vrot.lane.b32.xlu0 %v668_v49, %s2250_s22  ;;  %539 = vrot.lane.b32.xlu1 %v2033_v51, %s2245_s17 }
  0xd5   : > { %762 = vrot.lane.b32.xlu0 %v757_v52, %s2252_s24  ;;  %628 = vrot.lane.b32.xlu1 %v2033_v51, %s2247_s19 }
  0xd9   : > { %840 = vperm.xlu0 %2140, %v834_v53   ;;  %717 = vrot.lane.b32.xlu1 %v2033_v51, %s2249_s21 }
  0xdd   : > { %850 = vperm.xlu0 %2140, %v836_v54   ;;  %806 = vrot.lane.b32.xlu1 %v2033_v51, %s2251_s23 }
  0xe1   : > { %845 = vperm.xlu1 %2141, %v835_v55  }
  0xe5   : > { %855 = vperm.xlu1 %2141, %v837_v56  }
 0x11f   : > { %v536_v57 = vpop.permute.xlu0 %535  ;;  %v493_v58 = vpop.permute.xlu1 %492 }
 0x120   : > { %v497_v9 = vrot.slane %v493_v58, 4  ;;  %v541_v19 = vrot.slane %v536_v57, 4 }
 0x123   : > { %v625_v59 = vpop.permute.xlu0 %624  ;;  %v2389_v60 = vpop.permute.xlu1 %582 }
 0x124   : > { %v587_v10 = vrot.slane %v2389_v60, 4  ;;  %v630_v32 = vrot.slane %v625_v59, 4 }
 0x127   : > { %v714_v61 = vpop.permute.xlu0 %713  ;;  %v2391_v62 = vpop.permute.xlu1 %671 }
 0x128   : > { %v676_v20 = vrot.slane %v2391_v62, 4  ;;  %v719_v42 = vrot.slane %v714_v61, 4 }
 0x12b   : > { %v2393_v63 = vpop.permute.xlu0 %802  ;;  %v2395_v0 = vpop.permute.xlu1 %760 }
 0x12c   : > { %v765_v33 = vrot.slane %v2395_v0, 4  ;;  %v808_v53 = vrot.slane %v2393_v63, 4 }
 0x12f   : > { %v581_v5 = vpop.permute.xlu0 %580  ;;  %v491_v6 = vpop.permute.xlu1 %490 }
 0x130   : > { %v586_v11 = vrot.slane %v581_v5, 4  ;;  %v496_v12 = vrot.slane %v491_v6, 4 }
 0x132   : > { %v589_v13 = vsel %vm499_vm0, %v586_v11, %v587_v10  ;;  %v500_v14 = vsel %vm499_vm0, %v496_v12, %v497_v9 }
 0x133   : > { %v591_v15 = vsel %vm590_vm1, %v581_v5, %v589_v13  ;;  %v502_v16 = vsel %vm501_vm2, %v491_v6, %v500_v14  ;;  %v670_v17 = vpop.permute.xlu0 %669  ;;  %v2402_v18 = vpop.permute.xlu1 %537 }
 0x134   : > { %596 = vst [vmem:[#allocation3 + $0x10] sm:$0xcc] %v591_v15  ;;  %507 = vst [vmem:[#allocation3] sm:$0xcc] %v502_v16  ;;  %v675_v21 = vrot.slane %v670_v17, 4  ;;  %v542_v24 = vrot.slane %v2402_v18, 4 }
 0x136   : > { %v678_v25 = vsel %vm499_vm0, %v675_v21, %v676_v20  ;;  %v544_v26 = vsel %vm499_vm0, %v541_v19, %v542_v24 }
 0x137   : > { %v680_v27 = vsel %vm679_vm3, %v670_v17, %v678_v25  ;;  %v546_v28 = vsel %vm545_vm4, %v536_v57, %v544_v26  ;;  %v759_v29 = vpop.permute.xlu0 %758  ;;  %v2410_v31 = vpop.permute.xlu1 %626 }
 0x138   : > { %685 = vst [vmem:[#allocation3 + $0x20] sm:$0xcc] %v680_v27  ;;  %551 = vst [vmem:[#allocation3 + $0x10] sm:$0x33] %v546_v28  ;;  %v764_v34 = vrot.slane %v759_v29, 4  ;;  %v631_v35 = vrot.slane %v2410_v31, 4 }
 0x13a   : > { %v767_v36 = vsel %vm499_vm0, %v764_v34, %v765_v33  ;;  %v633_v37 = vsel %vm499_vm0, %v630_v32, %v631_v35 }
 0x13b   : > { %v769_v38 = vsel %vm768_vm5, %v759_v29, %v767_v36  ;;  %v635_v39 = vsel %vm634_vm6, %v625_v59, %v633_v37  ;;  %v495_v40 = vpop.permute.xlu0 %494  ;;  %v2418_v41 = vpop.permute.xlu1 %715 }
 0x13c   : > { %774 = vst [vmem:[#allocation3 + $0x30] sm:$0xcc] %v769_v38  ;;  %640 = vst [vmem:[#allocation3 + $0x20] sm:$0x33] %v635_v39  ;;  %v498_v43 = vrot.slane %v495_v40, 4  ;;  %v720_v44 = vrot.slane %v2418_v41, 4 }
 0x13d   : > { %v2158_v38 = vld [vmem:[%s2881_s4 + $0x8] sm:$0xff]  }
 0x13e   : > { %v503_v45 = vsel %vm499_vm0, %v497_v9, %v498_v43  ;;  %v722_v46 = vsel %vm499_vm0, %v719_v42, %v720_v44 }
 0x13f   : > { %v504_v47 = vsel %vm501_vm2, %v493_v58, %v503_v45  ;;  %v724_v48 = vsel %vm723_vm7, %v714_v61, %v722_v46  ;;  %v585_v49 = vpop.permute.xlu0 %584  ;;  %v2425_v50 = vpop.permute.xlu1 %804  ;;  %v2146_v51 = vld [vmem:[#allocation3 + $0x4] ss:$16 sps:$4 sm:$0xff]   ;;  %v2148_v52 = vld [vmem:[#allocation3] ss:$16 sps:$4 sm:$0xff]  }
 0x140   : > { %508 = vst [vmem:[#allocation3 + $0x8] sm:$0xcc] %v504_v47  ;;  %729 = vst [vmem:[#allocation3 + $0x30] sm:$0x33] %v724_v48  ;;  %v588_v54 = vrot.slane %v585_v49, 4  ;;  %v809_v55 = vrot.slane %v2425_v50, 4  ;;  %938 = vmatprep.subr.bf16.mxu1 %v2146_v51 }
 0x141   : > { %939 = vmatpush1.bf16.msra.mxu1 %v2148_v52 }
 0x142   : > { %v592_v56 = vsel %vm499_vm0, %v587_v10, %v588_v54  ;;  %v811_v57 = vsel %vm499_vm0, %v808_v53, %v809_v55 }
 0x143   : > { %v593_v58 = vsel %vm590_vm1, %v2389_v60, %v592_v56  ;;  %v813_v59 = vsel %vm812_vm8, %v2393_v63, %v811_v57  ;;  %v674_v61 = vpop.permute.xlu0 %673  ;;  %v540_v5 = vpop.permute.xlu1 %539 }
 0x144   : > { %597 = vst [vmem:[#allocation3 + $0x18] sm:$0xcc] %v593_v58  ;;  %818 = vst [vmem:[#allocation3 + $0x40] sm:$0x33] %v813_v59  ;;  %v677_v6 = vrot.slane %v674_v61, 4  ;;  %v543_v9 = vrot.slane %v540_v5, 4 }
 0x146   : > { %v681_v11 = vsel %vm499_vm0, %v676_v20, %v677_v6  ;;  %v547_v12 = vsel %vm499_vm0, %v542_v24, %v543_v9 }
 0x147   : > { %v682_v10 = vsel %vm679_vm3, %v2391_v62, %v681_v11  ;;  %v548_v13 = vsel %vm545_vm4, %v2402_v18, %v547_v12  ;;  %v763_v60 = vpop.permute.xlu0 %762  ;;  %v629_v14 = vpop.permute.xlu1 %628  ;;  %v2149_v15 = vld [vmem:[#allocation3 + $0x24] ss:$16 sps:$4 sm:$0xff]   ;;  %v2151_v63 = vld [vmem:[#allocation3 + $0x20] ss:$16 sps:$4 sm:$0xff]  }
 0x148   : > { %686 = vst [vmem:[#allocation3 + $0x28] sm:$0xcc] %v682_v10  ;;  %552 = vst [vmem:[#allocation3 + $0x18] sm:$0x33] %v548_v13  ;;  %v766_v16 = vrot.slane %v763_v60, 4  ;;  %v632_v17 = vrot.slane %v629_v14, 4  ;;  %940 = vmatprep.subr.bf16.mxu1 %v2149_v15 }
 0x149   : > { %941 = vmatpush1.bf16.msra.mxu1 %v2151_v63 }
 0x14a   : > { %v770_v19 = vsel %vm499_vm0, %v765_v33, %v766_v16  ;;  %v636_v20 = vsel %vm499_vm0, %v631_v35, %v632_v17 }
 0x14b   : > { %v771_v62 = vsel %vm768_vm5, %v2395_v0, %v770_v19  ;;  %v637_v18 = vsel %vm634_vm6, %v2410_v31, %v636_v20  ;;  %v718_v21 = vpop.permute.xlu1 %717  ;;  %v832_v24 = vld [vmem:[#allocation3 + $0x40] sm:$0x33]  ;;  %v2154_v0 = vld [vmem:[%s2881_s4] sm:$0xff]  }
 0x14c   : > { %775 = vst [vmem:[#allocation3 + $0x38] sm:$0xcc] %v771_v62  ;;  %641 = vst [vmem:[#allocation3 + $0x28] sm:$0x33] %v637_v18  ;;  %v721_v25 = vrot.slane %v718_v21, 4  ;;  %v2048_v26 = vcombine.high %v832_v24, %v832_v24  ;;  %v2047_v27 = vcombine.low %v832_v24, %v832_v24 }
 0x14e   : > { %v725_v28 = vsel %vm499_vm0, %v720_v44, %v721_v25  ;;  %2051 = vmatprep.subr.msk.bf16.mxu1 %vm925_vm9, %v2048_v26  ;;  %v927_v29 = vsel %vm925_vm9, %v2047_v27, 0 }
 0x14f   : > { %v726_v31 = vsel %vm723_vm7, %v2418_v41, %v725_v28  ;;  %v807_v32 = vpop.permute.xlu1 %806  ;;  %943 = vmatpush1.bf16.msra.mxu1 %v927_v29  ;;  %v2157_v33 = vld [vmem:[#allocation3 + $0xc] ss:$16 sps:$4 sm:$0xff]   ;;  %v2155_v35 = vld [vmem:[#allocation3 + $0x8] ss:$16 sps:$4 sm:$0xff]  }
 0x150   : > { %730 = vst [vmem:[#allocation3 + $0x38] sm:$0x33] %v726_v31  ;;  %v810_v34 = vrot.slane %v807_v32, 4  ;;  %991 = vmatprep.subr.bf16.mxu1 %v2157_v33 }
 0x152   : > { %v814_v36 = vsel %vm499_vm0, %v809_v55, %v810_v34  ;;  %2052 = vmatmul.mubr.msk.bf16.vlgmr.msra.gmra.mrb[0].mxu1 %vm918_vm10, %v2154_v0 }
 0x153   : > { %v815_v37 = vsel %vm812_vm8, %v2425_v50, %v814_v36  ;;  %992 = vmatpush1.bf16.msra.mxu1 %v2155_v35  ;;  %980 = vmatprep.mubr.bf16.mxu1 %v2243_v1 }
 0x154   : > { %819 = vst [vmem:[#allocation3 + $0x48] sm:$0x33] %v815_v37 }
 0x157   : > { %v2159_v39 = vld [vmem:[#allocation3 + $0x28] ss:$16 sps:$4 sm:$0xff]   ;;  %v2161_v40 = vld [vmem:[#allocation3 + $0x2c] ss:$16 sps:$4 sm:$0xff]  }
 0x158   : > { %993 = vmatprep.subr.bf16.mxu1 %v2161_v40  ;;  %v841_v45 = vpop.permute.xlu0 %840 }
 0x159   : > { %994 = vmatpush1.bf16.msra.mxu1 %v2159_v39 }
 0x15a   : > { %2053 = vmatmul.mubr.msk.bf16.gmra.mrb[4].mxu1 %vm918_vm10, %v2158_v38 }
 0x15b   : > { %v833_v41 = vld [vmem:[#allocation3 + $0x48] sm:$0x33]  ;;  %1023 = vmatprep.mubr.bf16.mxu1 %v2243_v1 }
 0x15c   : > { %v2050_v42 = vcombine.high %v833_v41, %v833_v41  ;;  %v2049_v43 = vcombine.low %v833_v41, %v833_v41  ;;  %v851_v59 = vpop.permute.xlu0 %850 }
 0x15e   : > { %2054 = vmatprep.subr.msk.bf16.mxu1 %vm925_vm9, %v2050_v42  ;;  %v933_v44 = vsel %vm925_vm9, %v2049_v43, 0 }
 0x15f   : > { %996 = vmatpush1.bf16.msra.mxu1 %v933_v44 }
 0x160   : > { %v846_v49 = vpop.permute.xlu1 %845 }
 0x162   : > { %2055 = vmatmul.mubr.msk.bf16.vlgmr.msra.gmra.mrb[8].mxu1 %vm918_vm10, %v2154_v0 }
 0x163   : > { %1033 = vmatprep.mubr.bf16.mxu1 %v2243_v1 }
 0x164   : > { %v2484_v9 = vpop.permute.xlu1 %855 }
 0x16a   : > { %2056 = vmatmul.mubr.msk.bf16.gmra.mrb[12].mxu1 %vm918_vm10, %v2158_v38 }
 0x225   : > { %v972_v46 = vpop.f32.mrb[0].mxu1 }
 0x226   : > { %v2470_v47 = vadd.f32 %v972_v46, %v841_v45  ;;  %v974_v48 = vpop.f32.mrb[1].mxu1 }
 0x227   : > { %v2472_v50 = vadd.f32 %v974_v48, %v841_v45  ;;  %v976_v51 = vpop.f32.mrb[2].mxu1  ;;  %v2515_v48 = vld [vmem:[%s2880_s3] sm:$0xf] }
 0x228   : > { %v2057_v52 = vmul.f32 -1.442695, %v2470_v47  ;;  %v2475_v53 = vadd.f32 %v976_v51, %v846_v49  ;;  %v978_v54 = vpop.f32.mrb[3].mxu1 }
 0x229   : > { %v2058_v55 = vmul.f32 -1.442695, %v2472_v50  ;;  %v2478_v56 = vadd.f32 %v978_v54, %v846_v49 }
 0x22a   : > { %2167 = vpow2.f32 %v2057_v52  ;;  %v2061_v57 = vmul.f32 -1.442695, %v2475_v53 }
 0x22b   : > { %2169 = vpow2.f32 %v2058_v55  ;;  %v2062_v58 = vmul.f32 -1.442695, %v2478_v56 }
 0x22c   : > { %2171 = vpow2.f32 %v2061_v57 }
 0x22d   : > { %2173 = vpow2.f32 %v2062_v58  ;;  %v982_v61 = vpop.f32.mrb[4].mxu1 }
 0x22e   : > { %v2482_v5 = vadd.f32 %v982_v61, %v851_v59  ;;  %v984_v6 = vpop.f32.mrb[5].mxu1 }
 0x22f   : > { %v2486_v11 = vadd.f32 %v984_v6, %v851_v59  ;;  %v986_v12 = vpop.f32.mrb[6].mxu1 }
 0x230   : > { %v2065_v10 = vmul.f32 -1.442695, %v2482_v5  ;;  %v2490_v13 = vadd.f32 %v986_v12, %v2484_v9  ;;  %v988_v60 = vpop.f32.mrb[7].mxu1 }
 0x231   : > { %v2066_v14 = vmul.f32 -1.442695, %v2486_v11  ;;  %v2494_v15 = vadd.f32 %v988_v60, %v2484_v9 }
 0x232   : > { %2175 = vpow2.f32 %v2065_v10  ;;  %v2069_v63 = vmul.f32 -1.442695, %v2490_v13 }
 0x233   : > { %2177 = vpow2.f32 %v2066_v14  ;;  %v2070_v16 = vmul.f32 -1.442695, %v2494_v15  ;;  %v1161_v14 = vrot.slane %v2515_v48, %v2321_v3 }
 0x234   : > { %v2168_v17 = vpop.eup %2167  ;;  %2179 = vpow2.f32 %v2069_v63 }
 0x235   : > { %v2170_v19 = vpop.eup %2169  ;;  %v1092_v20 = vadd.f32 1.0, %v2168_v17  ;;  %2181 = vpow2.f32 %v2070_v16  ;;  %v1025_v62 = vpop.f32.mrb[8].mxu1 }
 0x236   : > { %v2172_v18 = vpop.eup %2171  ;;  %v1093_v21 = vadd.f32 1.0, %v2170_v19  ;;  %v2498_v24 = vadd.f32 %v1025_v62, %v841_v45  ;;  %v1027_v25 = vpop.f32.mrb[9].mxu1 }
 0x237   : > { %v2174_v26 = vpop.eup %2173  ;;  %2183 = vrcp.f32 %v1092_v20  ;;  %v1096_v27 = vadd.f32 1.0, %v2172_v18  ;;  %v2500_v28 = vadd.f32 %v1027_v25, %v841_v45  ;;  %v1029_v29 = vpop.f32.mrb[10].mxu1 }
 0x238   : > { %2185 = vrcp.f32 %v1093_v21  ;;  %v1097_v0 = vadd.f32 1.0, %v2174_v26  ;;  %v2059_v31 = vmul.f32 -1.442695, %v2498_v24  ;;  %v2503_v32 = vadd.f32 %v1029_v29, %v846_v49  ;;  %v1031_v33 = vpop.f32.mrb[11].mxu1 }
 0x239   : > { %2187 = vrcp.f32 %v1096_v27  ;;  %v2060_v34 = vmul.f32 -1.442695, %v2500_v28  ;;  %v2506_v35 = vadd.f32 %v1031_v33, %v846_v49  ;;  %v1164_v49 = vsub.s32 1, %v2313_v2 }
 0x23a   : > { %2189 = vrcp.f32 %v1097_v0  ;;  %v2063_v36 = vmul.f32 -1.442695, %v2503_v32 }
 0x23b   : > { %2191 = vpow2.f32 %v2059_v31  ;;  %v2064_v37 = vmul.f32 -1.442695, %v2506_v35  ;;  %v1165_v19 = vrot.slane %v2515_v48, %v1164_v49 }
 0x23c   : > { %v2176_v38 = vpop.eup %2175  ;;  %2193 = vpow2.f32 %v2060_v34 }
 0x23d   : > { %v2178_v39 = vpop.eup %2177  ;;  %v1100_v40 = vadd.f32 1.0, %v2176_v38  ;;  %2195 = vpow2.f32 %v2063_v36  ;;  %v1035_v41 = vpop.f32.mrb[12].mxu1 }
 0x23e   : > { %v2180_v42 = vpop.eup %2179  ;;  %v1101_v43 = vadd.f32 1.0, %v2178_v39  ;;  %2197 = vpow2.f32 %v2064_v37  ;;  %v2510_v44 = vadd.f32 %v1035_v41, %v851_v59  ;;  %v1037_v45 = vpop.f32.mrb[13].mxu1 }
 0x23f   : > { %v2182_v46 = vpop.eup %2181  ;;  %2199 = vrcp.f32 %v1100_v40  ;;  %v1104_v51 = vadd.f32 1.0, %v2180_v42  ;;  %v2518_v52 = vadd.f32 %v1037_v45, %v851_v59  ;;  %v1039_v54 = vpop.f32.mrb[14].mxu1 }
 0x240   : > { %2201 = vrcp.f32 %v1101_v43  ;;  %v1105_v55 = vadd.f32 1.0, %v2182_v46  ;;  %v2067_v57 = vmul.f32 -1.442695, %v2510_v44  ;;  %v2522_v58 = vadd.f32 %v1039_v54, %v2484_v9  ;;  %v1041_v61 = vpop.f32.mrb[15].mxu1 }
 0x241   : > { %v2184_v6 = vpop.eup %2183  ;;  %2203 = vrcp.f32 %v1104_v51  ;;  %v2068_v12 = vmul.f32 -1.442695, %v2518_v52  ;;  %v2526_v10 = vadd.f32 %v1041_v61, %v2484_v9 }
 0x242   : > { %v2186_v60 = vpop.eup %2185  ;;  %v1140_v59 = vmul.f32 %v2184_v6, %v2470_v47  ;;  %2205 = vrcp.f32 %v1105_v55  ;;  %v2071_v63 = vmul.f32 -1.442695, %v2522_v58 }
 0x243   : > { %v2188_v16 = vpop.eup %2187  ;;  %v1141_v17 = vmul.f32 %v2186_v60, %v2472_v50  ;;  %2207 = vpow2.f32 %v2067_v57  ;;  %v2072_v20 = vmul.f32 -1.442695, %v2526_v10 }
 0x244   : > { %v2190_v62 = vpop.eup %2189  ;;  %v1144_v9 = vmul.f32 %v2188_v16, %v2475_v53  ;;  %2209 = vpow2.f32 %v2068_v12  ;;  %v1178_v25 = vmul.f32 %v1161_v14, %v1140_v59 }
 0x245   : > { %v2192_v18 = vpop.eup %2191  ;;  %v1145_v47 = vmul.f32 %v2190_v62, %v2478_v56  ;;  %2211 = vpow2.f32 %v2071_v63  ;;  %v1179_v50 = vmul.f32 %v1165_v19, %v1141_v17 }
 0x246   : > { %v2194_v21 = vpop.eup %2193  ;;  %v1182_v26 = vmul.f32 %v1161_v14, %v1144_v9  ;;  %v1094_v27 = vadd.f32 1.0, %v2192_v18  ;;  %2213 = vpow2.f32 %v2072_v20 }
 0x247   : > { %v2196_v29 = vpop.eup %2195  ;;  %v1183_v0 = vmul.f32 %v1165_v19, %v1145_v47  ;;  %v1095_v31 = vadd.f32 1.0, %v2194_v21 }
 0x248   : > { %v2198_v33 = vpop.eup %2197  ;;  %v2537_v34 = vpack.c.bf16 %v1182_v26, %v1178_v25  ;;  %2215 = vrcp.f32 %v1094_v27  ;;  %v1098_v36 = vadd.f32 1.0, %v2196_v29 }
 0x249   : > { %v2200_v53 = vpop.eup %2199  ;;  %v2539_v37 = vpack.c.bf16 %v1183_v0, %v1179_v50  ;;  %2217 = vrcp.f32 %v1095_v31  ;;  %v1099_v56 = vadd.f32 1.0, %v2198_v33 }
 0x24a   : > { %v2202_v38 = vpop.eup %2201  ;;  %v1148_v39 = vmul.f32 %v2200_v53, %v2482_v5  ;;  %2219 = vrcp.f32 %v1098_v36  ;;  %1438 = vrot.lane.b32.xlu1 %v2537_v34, %s2250_s22  ;;  %1238 = vrot.lane.b32.xlu0 %v2537_v34, %s2246_s18 }
 0x24b   : > { %v2204_v40 = vpop.eup %2203  ;;  %v1149_v41 = vmul.f32 %v2202_v38, %v2486_v11  ;;  %2221 = vrcp.f32 %v1099_v56  ;;  %1706 = vmatprep.subr.bf16.mxu0 %v2539_v37 }
 0x24c   : > { %v2206_v42 = vpop.eup %2205  ;;  %v1152_v43 = vmul.f32 %v2204_v40, %v2490_v13  ;;  %1707 = vmatpush1.bf16.msra.mxu0 %v2537_v34  ;;  %v1186_v49 = vmul.f32 %v1161_v14, %v1148_v39  ;;  %v1168_v13 = vsub.s32 2, %v2313_v2 }
 0x24d   : > { %v2208_v45 = vpop.eup %2207  ;;  %v1153_v5 = vmul.f32 %v2206_v42, %v2494_v15  ;;  %v1187_v55 = vmul.f32 %v1165_v19, %v1149_v41  ;;  %v1172_v15 = vsub.s32 3, %v2313_v2  ;;  %v1870_v41 = vmul.f32 0.5, %v2323_v4 }
 0x24e   : > { %v2210_v46 = vpop.eup %2209  ;;  %v1190_v51 = vmul.f32 %v1161_v14, %v1152_v43  ;;  %v1102_v54 = vadd.f32 1.0, %v2208_v45  ;;  %1440 = vrot.lane.b32.xlu1 %v2539_v37, %s2250_s22  ;;  %1288 = vrot.lane.b32.xlu0 %v2537_v34, %s2245_s17 }
 0x24f   : > { %v2212_v11 = vpop.eup %2211  ;;  %v1191_v57 = vmul.f32 %v1165_v19, %v1153_v5  ;;  %v1103_v61 = vadd.f32 1.0, %v2210_v46  ;;  %v1169_v19 = vrot.slane %v2515_v48, %v1168_v13  ;;  %v1173_v62 = vrot.slane %v2515_v48, %v1172_v15 }
 0x250   : > { %v2214_v6 = vpop.eup %2213  ;;  %v2556_v12 = vpack.c.bf16 %v1190_v51, %v1186_v49  ;;  %2223 = vrcp.f32 %v1102_v54  ;;  %v1106_v60 = vadd.f32 1.0, %v2212_v11  ;;  %v1871_v4 = vmul.f32 %v2332_v8, %v1870_v41  ;;  %v1677_v51 = vld [vmem:[%s2884_s7] sm:$0xf] }
 0x251   : > { %v2559_v59 = vpack.c.bf16 %v1191_v57, %v1187_v55  ;;  %2225 = vrcp.f32 %v1103_v61  ;;  %v1107_v14 = vadd.f32 1.0, %v2214_v6 }
 0x252   : > { %v2216_v63 = vpop.eup %2215  ;;  %2227 = vrcp.f32 %v1106_v60  ;;  %1246 = vrot.lane.b32.xlu1 %v2556_v12, %s2246_s18  ;;  %1338 = vrot.lane.b32.xlu0 %v2537_v34, %s2248_s20  ;;  %v1887_v46 = vrot.slane %v1871_v4, %v2321_v3 }
 0x253   : > { %v2218_v16 = vpop.eup %2217  ;;  %v1142_v17 = vmul.f32 %v2216_v63, %v2498_v24  ;;  %2229 = vrcp.f32 %v1107_v14  ;;  %1708 = vmatprep.subr.bf16.mxu0 %v2559_v59 }
 0x254   : > { %v2220_v2 = vpop.eup %2219  ;;  %v1143_v20 = vmul.f32 %v2218_v16, %v2500_v28  ;;  %1709 = vmatpush1.bf16.msra.mxu0 %v2556_v12  ;;  %2231 = vrcp.f32 %v2329_v7 }
 0x255   : > { %v2222_v9 = vpop.eup %2221  ;;  %v1146_v18 = vmul.f32 %v2220_v2, %v2503_v32  ;;  %v1180_v24 = vmul.f32 %v1169_v19, %v1142_v17 }
 0x256   : > { %v1147_v47 = vmul.f32 %v2222_v9, %v2506_v35  ;;  %1296 = vrot.lane.b32.xlu1 %v2556_v12, %s2245_s17  ;;  %1388 = vrot.lane.b32.xlu0 %v2537_v34, %s2247_s19  ;;  %v1181_v25 = vmul.f32 %v1173_v62, %v1143_v20 }
 0x257   : > { %v1184_v21 = vmul.f32 %v1169_v19, %v1146_v18 }
 0x258   : > { %v1185_v26 = vmul.f32 %v1173_v62, %v1147_v47 }
 0x259   : > { %v2577_v28 = vpack.c.bf16 %v1184_v21, %v1180_v24 }
 0x25a   : > { %v2224_v48 = vpop.eup %2223  ;;  %v2579_v27 = vpack.c.bf16 %v1185_v26, %v1181_v25  ;;  %1346 = vrot.lane.b32.xlu1 %v2556_v12, %s2248_s20  ;;  %1488 = vrot.lane.b32.xlu0 %v2537_v34, %s2249_s21 }
 0x25b   : > { %v2226_v32 = vpop.eup %2225  ;;  %v1150_v35 = vmul.f32 %v2224_v48, %v2510_v44 }
 0x25c   : > { %v2228_v29 = vpop.eup %2227  ;;  %v1151_v50 = vmul.f32 %v2226_v32, %v2518_v52  ;;  %v2676_v52 = vld [vmem:[%s2883_s6] sm:$0x3f] }
 0x25d   : > { %v2230_v0 = vpop.eup %2229  ;;  %v1154_v31 = vmul.f32 %v2228_v29, %v2522_v58  ;;  %v1188_v36 = vmul.f32 %v1169_v19, %v1150_v35  ;;  %v2684_v58 = vrot.slane %v2676_v52, %v2350_v30 }
 0x25e   : > { %v1155_v33 = vmul.f32 %v2230_v0, %v2526_v10  ;;  %1396 = vrot.lane.b32.xlu1 %v2556_v12, %s2247_s19  ;;  %1240 = vrot.lane.b32.xlu0 %v2539_v37, %s2246_s18  ;;  %v1189_v56 = vmul.f32 %v1173_v62, %v1151_v50 }
 0x25f   : > { %v1192_v53 = vmul.f32 %v1169_v19, %v1154_v31  ;;  %v1699_v10 = vcombine.high %v2684_v58, %v2684_v58 }
 0x260   : > { %v1193_v38 = vmul.f32 %v1173_v62, %v1155_v33 }
 0x261   : > { %v2593_v39 = vpack.c.bf16 %v1192_v53, %v1188_v36  ;;  %1738 = vmatprep.mubr.bf16.mxu0 %v1699_v10  ;;  %1820 = vmatprep.mubr.bf16.mxu1 %v1699_v10 }
 0x262   : > { %v2595_v44 = vpack.c.bf16 %v1193_v38, %v1189_v56  ;;  %1446 = vrot.lane.b32.xlu1 %v2556_v12, %s2250_s22  ;;  %1290 = vrot.lane.b32.xlu0 %v2539_v37, %s2245_s17 }
 0x266   : > { %1496 = vrot.lane.b32.xlu1 %v2556_v12, %s2249_s21  ;;  %1340 = vrot.lane.b32.xlu0 %v2539_v37, %s2248_s20 }
 0x26a   : > { %1248 = vrot.lane.b32.xlu1 %v2559_v59, %s2246_s18  ;;  %1390 = vrot.lane.b32.xlu0 %v2539_v37, %s2247_s19 }
 0x26e   : > { %1298 = vrot.lane.b32.xlu1 %v2559_v59, %s2245_s17  ;;  %1490 = vrot.lane.b32.xlu0 %v2539_v37, %s2249_s21 }
 0x272   : > { %1348 = vrot.lane.b32.xlu1 %v2559_v59, %s2248_s20  ;;  %1540 = vrot.lane.b32.xlu0 %v2539_v37, %s2252_s24 }
 0x276   : > { %1398 = vrot.lane.b32.xlu1 %v2559_v59, %s2247_s19  ;;  %1442 = vrot.lane.b32.xlu0 %v2577_v28, %s2250_s22 }
 0x27a   : > { %1448 = vrot.lane.b32.xlu1 %v2559_v59, %s2250_s22  ;;  %1394 = vrot.lane.b32.xlu0 %v2579_v27, %s2247_s19 }
 0x27e   : > { %1498 = vrot.lane.b32.xlu1 %v2559_v59, %s2249_s21  ;;  %1444 = vrot.lane.b32.xlu0 %v2579_v27, %s2250_s22 }
 0x282   : > { %1494 = vrot.lane.b32.xlu0 %v2579_v27, %s2249_s21  ;;  %1242 = vrot.lane.b32.xlu1 %v2577_v28, %s2246_s18 }
 0x286   : > { %1250 = vrot.lane.b32.xlu0 %v2593_v39, %s2246_s18  ;;  %1292 = vrot.lane.b32.xlu1 %v2577_v28, %s2245_s17 }
 0x28a   : > { %1538 = vrot.lane.b32.xlu0 %v2537_v34, %s2252_s24  ;;  %1342 = vrot.lane.b32.xlu1 %v2577_v28, %s2248_s20 }
 0x28e   : > { %1300 = vrot.lane.b32.xlu0 %v2593_v39, %s2245_s17  ;;  %1392 = vrot.lane.b32.xlu1 %v2577_v28, %s2247_s19 }
 0x292   : > { %1350 = vrot.lane.b32.xlu0 %v2593_v39, %s2248_s20  ;;  %1492 = vrot.lane.b32.xlu1 %v2577_v28, %s2249_s21 }
 0x296   : > { %1400 = vrot.lane.b32.xlu0 %v2593_v39, %s2247_s19  ;;  %1542 = vrot.lane.b32.xlu1 %v2577_v28, %s2252_s24 }
 0x29a   : > { %1450 = vrot.lane.b32.xlu0 %v2593_v39, %s2250_s22  ;;  %1244 = vrot.lane.b32.xlu1 %v2579_v27, %s2246_s18 }
 0x29e   : > { %1500 = vrot.lane.b32.xlu0 %v2593_v39, %s2249_s21  ;;  %1294 = vrot.lane.b32.xlu1 %v2579_v27, %s2245_s17 }
 0x2a2   : > { %1550 = vrot.lane.b32.xlu0 %v2593_v39, %s2252_s24  ;;  %1548 = vrot.lane.b32.xlu1 %v2559_v59, %s2252_s24 }
 0x2a6   : > { %1402 = vrot.lane.b32.xlu0 %v2595_v44, %s2247_s19  ;;  %1546 = vrot.lane.b32.xlu1 %v2556_v12, %s2252_s24  ;;  %s2255_s19 = smov 50  }
 0x2aa   : > { %1544 = vrot.lane.b32.xlu0 %v2579_v27, %s2252_s24  ;;  %1452 = vrot.lane.b32.xlu1 %v2595_v44, %s2250_s22 }
 0x2ae   : > { %1252 = vrot.lane.b32.xlu0 %v2595_v44, %s2246_s18  ;;  %1344 = vrot.lane.b32.xlu1 %v2579_v27, %s2248_s20 }
 0x2b2   : > { %1590 = vrot.lane.b32.xlu0 %v2539_v37, %s2251_s23  ;;  %1502 = vrot.lane.b32.xlu1 %v2595_v44, %s2249_s21 }
 0x2b6   : > { %1302 = vrot.lane.b32.xlu0 %v2595_v44, %s2245_s17  ;;  %1592 = vrot.lane.b32.xlu1 %v2577_v28, %s2251_s23 }
 0x2ba   : > { %1588 = vrot.lane.b32.xlu0 %v2537_v34, %s2251_s23  ;;  %1594 = vrot.lane.b32.xlu1 %v2579_v27, %s2251_s23  ;;  %v2232_v34 = vpop.eup %2231 }
 0x2bb   : > { %v1869_v49 = vmul.f32 0.25, %v2232_v34 }
 0x2bc   : > { %v1439_v37 = vpop.permute.xlu1 %1438  ;;  %v1239_v40 = vpop.permute.xlu0 %1238 }
 0x2bd   : > { %v1876_v8 = vrot.slane %v1869_v49, %v2321_v3 }
 0x2be   : > { %1552 = vrot.lane.b32.xlu0 %v2595_v44, %s2252_s24  ;;  %1352 = vrot.lane.b32.xlu1 %v2595_v44, %s2248_s20  ;;  %s2118_s20 = smul.u32 12, %s2887_s28 }
 0x2c0   : > { %v2706_v42 = vpop.permute.xlu1 %1440  ;;  %v1289_v43 = vpop.permute.xlu0 %1288  ;;  %s359_s24 = scalar_lea.vmem %s2885_s8, %s2118_s20 }
 0x2c1   : > { %v2710_v7 = vsel %vm679_vm3, %v1439_v37, %v2706_v42 }
 0x2c2   : > { %1598 = vrot.lane.b32.xlu0 %v2559_v59, %s2251_s23  ;;  %1600 = vrot.lane.b32.xlu1 %v2593_v39, %s2251_s23 }
 0x2c4   : > { %v1247_v45 = vpop.permute.xlu1 %1246  ;;  %v2717_v5 = vpop.permute.xlu0 %1338 }
 0x2c6   : > { %1596 = vrot.lane.b32.xlu0 %v2556_v12, %s2251_s23  ;;  %1602 = vrot.lane.b32.xlu1 %v2595_v44, %s2251_s23 }
 0x2c8   : > { %v1297_v54 = vpop.permute.xlu1 %1296  ;;  %v2727_v11 = vpop.permute.xlu0 %1388 }
 0x2ca   : > { %1680 = vperm.xlu0 %2140, %v1677_v51   ;;  %1889 = vperm.xlu1 %2141, %v1887_v46  }
 0x2cc   : > { %v1347_v55 = vpop.permute.xlu1 %1346  ;;  %v2730_v57 = vpop.permute.xlu0 %1488 }
 0x2ce   : > { %1878 = vperm.xlu0 %2140, %v1876_v8  }
 0x2d0   : > { %v2732_v13 = vpop.permute.xlu1 %1396  ;;  %v1241_v61 = vpop.permute.xlu0 %1240 }
 0x2d1   : > { %v1254_v25 = vsel %vm501_vm2, %v1239_v40, %v1241_v61 }
 0x2d4   : > { %v2734_v6 = vpop.permute.xlu1 %1446  ;;  %v1291_v12 = vpop.permute.xlu0 %1290 }
 0x2d5   : > { %v1304_v0 = vsel %vm545_vm4, %v1289_v43, %v1291_v12 }
 0x2d8   : > { %v2736_v15 = vpop.permute.xlu1 %1496  ;;  %v1341_v60 = vpop.permute.xlu0 %1340 }
 0x2d9   : > { %v1354_v37 = vsel %vm590_vm1, %v2717_v5, %v1341_v60 }
 0x2dc   : > { %v1249_v59 = vpop.permute.xlu1 %1248  ;;  %v1391_v14 = vpop.permute.xlu0 %1390 }
 0x2dd   : > { %v1257_v32 = vsel %vm501_vm2, %v1247_v45, %v1249_v59  ;;  %v1404_v46 = vsel %vm634_vm6, %v2727_v11, %v1391_v14 }
 0x2e0   : > { %v1299_v63 = vpop.permute.xlu1 %1298  ;;  %v2738_v16 = vpop.permute.xlu0 %1490 }
 0x2e1   : > { %v1307_v56 = vsel %vm545_vm4, %v1297_v54, %v1299_v63 }
 0x2e4   : > { %v1349_v17 = vpop.permute.xlu1 %1348  ;;  %v2740_v3 = vpop.permute.xlu0 %1540 }
 0x2e8   : > { %v1399_v19 = vpop.permute.xlu1 %1398  ;;  %v2742_v2 = vpop.permute.xlu0 %1442 }
 0x2e9   : > { %v1407_v54 = vsel %vm634_vm6, %v2732_v13, %v1399_v19  ;;  %v1455_v8 = vsel %vm679_vm3, %v2706_v42, %v2742_v2 }
 0x2ec   : > { %v2744_v20 = vpop.permute.xlu1 %1448  ;;  %v1395_v62 = vpop.permute.xlu0 %1394 }
 0x2ed   : > { %v1457_v13 = vsel %vm679_vm3, %v2734_v6, %v2744_v20  ;;  %v1504_v6 = vsel %vm723_vm7, %v2730_v57, %v2738_v16 }
 0x2f0   : > { %v2746_v9 = vpop.permute.xlu1 %1498  ;;  %v2748_v18 = vpop.permute.xlu0 %1444 }
 0x2f4   : > { %v2750_v47 = vpop.permute.xlu0 %1494  ;;  %v2752_v24 = vpop.permute.xlu1 %1242 }
 0x2f5   : > { %v1255_v21 = vsel %vm501_vm2, %v1241_v61, %v2752_v24 }
 0x2f6   : > { %1710 = vmatprep.subr.bf16.mxu0 %v1255_v21 }
 0x2f7   : > { %1711 = vmatpush1.bf16.msra.mxu0 %v1254_v25 }
 0x2f8   : > { %v2757_v26 = vpop.permute.xlu0 %1250  ;;  %v2759_v48 = vpop.permute.xlu1 %1292 }
 0x2f9   : > { %v1258_v27 = vsel %vm501_vm2, %v1249_v59, %v2757_v26  ;;  %v1305_v35 = vsel %vm545_vm4, %v1291_v12, %v2759_v48 }
 0x2fa   : > { %1712 = vmatprep.subr.bf16.mxu0 %v1258_v27 }
 0x2fb   : > { %1713 = vmatpush1.bf16.msra.mxu0 %v1257_v32 }
 0x2fc   : > { %v2766_v29 = vpop.permute.xlu0 %1538  ;;  %1714 = vmatprep.subr.bf16.mxu0 %v1305_v35  ;;  %v2768_v50 = vpop.permute.xlu1 %1342 }
 0x2fd   : > { %v1355_v38 = vsel %vm590_vm1, %v1341_v60, %v2768_v50 }
 0x2ff   : > { %1715 = vmatpush1.bf16.msra.mxu0 %v1304_v0 }
 0x300   : > { %v2771_v31 = vpop.permute.xlu0 %1300  ;;  %v1393_v33 = vpop.permute.xlu1 %1392 }
 0x301   : > { %v1308_v36 = vsel %vm545_vm4, %v1299_v63, %v2771_v31  ;;  %v1406_v53 = vsel %vm634_vm6, %v1393_v33, %v1395_v62  ;;  %v1405_v4 = vsel %vm634_vm6, %v1391_v14, %v1393_v33 }
 0x302   : > { %1716 = vmatprep.subr.bf16.mxu0 %v1308_v36  ;;  %2078 = vmatprep.subr.bf16.mxu1 %v1406_v53 }
 0x303   : > { %1717 = vmatpush1.bf16.msra.mxu0 %v1307_v56  ;;  %2079 = vmatpush3.bf16.msra.mxu1 %v2577_v28  ;;  %v1357_v28 = vsel %vm590_vm1, %v1347_v55, %v1349_v17 }
 0x304   : > { %v2780_v44 = vpop.permute.xlu0 %1350  ;;  %1718 = vmatprep.subr.bf16.mxu0 %v1355_v38  ;;  %v1493_v10 = vpop.permute.xlu1 %1492 }
 0x305   : > { %v1358_v40 = vsel %vm590_vm1, %v1349_v17, %v2780_v44  ;;  %v1505_v42 = vsel %vm723_vm7, %v2738_v16, %v1493_v10  ;;  %v1506_v16 = vsel %vm723_vm7, %v1493_v10, %v2750_v47 }
 0x307   : > { %1719 = vmatpush1.bf16.msra.mxu0 %v1354_v37 }
 0x308   : > { %v1401_v41 = vpop.permute.xlu0 %1400  ;;  %1720 = vmatprep.subr.bf16.mxu0 %v1358_v40  ;;  %v2786_v43 = vpop.permute.xlu1 %1542  ;;  %v2253_v40 = vmov 0.0  }
 0x309   : > { %v1408_v5 = vsel %vm634_vm6, %v1399_v19, %v1401_v41  ;;  %v1555_v57 = vsel %vm768_vm5, %v2740_v3, %v2786_v43 }
 0x30b   : > { %1721 = vmatpush1.bf16.msra.mxu0 %v1357_v28 }
 0x30c   : > { %v1451_v34 = vpop.permute.xlu0 %1450  ;;  %1722 = vmatprep.subr.bf16.mxu0 %v1405_v4  ;;  %v1245_v45 = vpop.permute.xlu1 %1244 }
 0x30d   : > { %v1458_v11 = vsel %vm679_vm3, %v2744_v20, %v1451_v34  ;;  %v1256_v17 = vsel %vm501_vm2, %v2752_v24, %v1245_v45 }
 0x30f   : > { %1723 = vmatpush1.bf16.msra.mxu0 %v1404_v46 }
 0x310   : > { %v1501_v49 = vpop.permute.xlu0 %1500  ;;  %1724 = vmatprep.subr.bf16.mxu0 %v1408_v5  ;;  %v1295_v51 = vpop.permute.xlu1 %1294 }
 0x311   : > { %v1306_v25 = vsel %vm545_vm4, %v2759_v48, %v1295_v51 }
 0x313   : > { %1725 = vmatpush1.bf16.msra.mxu0 %v1407_v54 }
 0x314   : > { %v2798_v55 = vpop.permute.xlu0 %1550  ;;  %1726 = vmatprep.subr.bf16.mxu0 %v1455_v8  ;;  %v1549_v61 = vpop.permute.xlu1 %1548 }
 0x317   : > { %1727 = vmatpush1.bf16.msra.mxu0 %v2710_v7  ;;  %v1456_v7 = vsel %vm679_vm3, %v2742_v2, %v2748_v18  ;;  %v1507_v18 = vsel %vm723_vm7, %v2736_v15, %v2746_v9  ;;  %v1554_v15 = vsel %vm768_vm5, %v2766_v29, %v2740_v3 }
 0x318   : > { %v1403_v12 = vpop.permute.xlu0 %1402  ;;  %1728 = vmatprep.subr.bf16.mxu0 %v1458_v11  ;;  %v1547_v60 = vpop.permute.xlu1 %1546 }
 0x319   : > { %v1409_v59 = vsel %vm634_vm6, %v1401_v41, %v1403_v12  ;;  %v1557_v48 = vsel %vm768_vm5, %v1547_v60, %v1549_v61 }
 0x31a   : > { %2080 = vmatprep.subr.bf16.mxu1 %v1409_v59 }
 0x31b   : > { %1729 = vmatpush1.bf16.msra.mxu0 %v1457_v13  ;;  %2081 = vmatpush3.bf16.msra.mxu1 %v2593_v39  ;;  %v1508_v39 = vsel %vm723_vm7, %v2746_v9, %v1501_v49  ;;  %v1558_v9 = vsel %vm768_vm5, %v1549_v61, %v2798_v55 }
 0x31c   : > { %v1545_v14 = vpop.permute.xlu0 %1544  ;;  %1730 = vmatprep.subr.bf16.mxu0 %v1505_v42  ;;  %2082 = vmatprep.subr.bf16.mxu1 %v1456_v7  ;;  %v1453_v63 = vpop.permute.xlu1 %1452 }
 0x31d   : > { %v1459_v19 = vsel %vm679_vm3, %v1451_v34, %v1453_v63  ;;  %v1556_v35 = vsel %vm768_vm5, %v2786_v43, %v1545_v14 }
 0x31f   : > { %1731 = vmatpush1.bf16.msra.mxu0 %v1504_v6  ;;  %2083 = vmatpush3.bf16.msra.mxu1 %v1256_v17 }
 0x320   : > { %v1253_v20 = vpop.permute.xlu0 %1252  ;;  %1732 = vmatprep.subr.bf16.mxu0 %v1508_v39  ;;  %2084 = vmatprep.subr.bf16.mxu1 %v1459_v19  ;;  %v1345_v2 = vpop.permute.xlu1 %1344 }
 0x321   : > { %v1259_v62 = vsel %vm501_vm2, %v2757_v26, %v1253_v20  ;;  %v1356_v36 = vsel %vm590_vm1, %v2768_v50, %v1345_v2  ;;  %v1684_v50 = vcombine.high %v2676_v52, %v2676_v52 }
 0x323   : > { %1733 = vmatpush1.bf16.msra.mxu0 %v1507_v18  ;;  %2085 = vmatpush3.bf16.msra.mxu1 %v1259_v62  ;;  %v1698_v28 = vrot.slane %v1684_v50, %v2350_v30 }
 0x324   : > { %v1591_v24 = vpop.permute.xlu0 %1590  ;;  %1734 = vmatprep.subr.bf16.mxu0 %v1555_v57  ;;  %2086 = vmatprep.subr.bf16.mxu1 %v1506_v16  ;;  %v1503_v21 = vpop.permute.xlu1 %1502 }
 0x325   : > { %v1509_v26 = vsel %vm723_vm7, %v1501_v49, %v1503_v21 }
 0x327   : > { %1735 = vmatpush1.bf16.msra.mxu0 %v1554_v15  ;;  %2087 = vmatpush3.bf16.msra.mxu1 %v1306_v25 }
 0x328   : > { %v1303_v27 = vpop.permute.xlu0 %1302  ;;  %1736 = vmatprep.subr.bf16.mxu0 %v1558_v9  ;;  %2088 = vmatprep.subr.bf16.mxu1 %v1509_v26  ;;  %v1593_v47 = vpop.permute.xlu1 %1592 }
 0x329   : > { %v1309_v32 = vsel %vm545_vm4, %v2771_v31, %v1303_v27  ;;  %v1605_v3 = vsel %vm812_vm8, %v1591_v24, %v1593_v47 }
 0x32b   : > { %1737 = vmatpush1.bf16.msra.mxu0 %v1557_v48  ;;  %2089 = vmatpush3.bf16.msra.mxu1 %v1309_v32 }
 0x32c   : > { %v1589_v29 = vpop.permute.xlu0 %1588  ;;  %1747 = vmatprep.subr.bf16.mxu0 %v1605_v3  ;;  %2090 = vmatprep.subr.bf16.mxu1 %v1556_v35  ;;  %v1595_v0 = vpop.permute.xlu1 %1594 }
 0x32d   : > { %v1604_v33 = vsel %vm812_vm8, %v1589_v29, %v1591_v24  ;;  %v1606_v43 = vsel %vm812_vm8, %v1593_v47, %v1595_v0 }
 0x32e   : > { %1739 = vmatmul.mubr.bf16.vlgmr.msra.gmra.mrb[0].mxu0 %v2684_v58 }
 0x32f   : > { %1748 = vmatpush1.bf16.msra.mxu0 %v1604_v33  ;;  %2091 = vmatpush3.bf16.msra.mxu1 %v1356_v36 }
 0x330   : > { %v1553_v31 = vpop.permute.xlu0 %1552  ;;  %v1353_v53 = vpop.permute.xlu1 %1352  ;;  %1779 = vmatprep.mubr.bf16.mxu0 %v2243_v1 }
 0x331   : > { %v1359_v56 = vsel %vm590_vm1, %v2780_v44, %v1353_v53  ;;  %v1559_v38 = vsel %vm768_vm5, %v2798_v55, %v1553_v31 }
 0x332   : > { %2092 = vmatprep.subr.bf16.mxu1 %v1559_v38 }
 0x333   : > { %2093 = vmatpush3.bf16.msra.mxu1 %v1359_v56 }
 0x334   : > { %v1599_v10 = vpop.permute.xlu0 %1598  ;;  %v1601_v37 = vpop.permute.xlu1 %1600  ;;  %2103 = vmatprep.subr.bf16.mxu1 %v2253_v40 }
 0x335   : > { %v1608_v41 = vsel %vm812_vm8, %v1599_v10, %v1601_v37 }
 0x336   : > { %1749 = vmatprep.subr.bf16.mxu0 %v1608_v41  ;;  %1821 = vmatmul.mubr.bf16.vlgmr.msra.gmra.mrb[16].mxu1 %v2684_v58 }
 0x337   : > { %2104 = vmatpush3.bf16.msra.mxu1 %v1606_v43  ;;  %2107 = vmatprep.mubr.msk.bf16.mxu1 %vm2254_vm11, %v2253_v40 }
 0x338   : > { %v1597_v1 = vpop.permute.xlu0 %1596  ;;  %v1603_v44 = vpop.permute.xlu1 %1602  ;;  %2105 = vmatprep.subr.bf16.mxu1 %v2253_v40 }
 0x339   : > { %v1607_v4 = vsel %vm812_vm8, %v1597_v1, %v1599_v10  ;;  %v1609_v34 = vsel %vm812_vm8, %v1601_v37, %v1603_v44 }
 0x33a   : > { %1750 = vmatpush1.bf16.msra.mxu0 %v1607_v4 }
 0x33b   : > { %2106 = vmatpush3.bf16.msra.mxu1 %v1609_v34 }
 0x33d   : > { %2073 = vmatmul.mubr.msk.bf16.vlgmr.msra.gmra.mrb[0].mxu0 %vm1702_vm12, %v1698_v28 }
 0x33e   : > { %2108 = vmatmul.mubr.msk.bf16.vlgmr.msra.gmra.mrb[20].mxu1 %vm1702_vm12, %v1698_v28 }
 0x349   : > { %v1681_v49 = vpop.permute.xlu0 %1680  ;;  %v1890_v51 = vpop.permute.xlu1 %1889 }
 0x34d   : > { %v1879_v39 = vpop.permute.xlu0 %1878 }
 0x34e   : > { %v1881_v18 = vmul.f32 %v1879_v39, %v2343_v22  ;;  %v1882_v57 = vmul.f32 %v1879_v39, %v2345_v23 }
 0x409   : > { %v2094_v52 = vpop.f32.mrb[16].mxu1 }
 0x40a   : > { %v2095_v45 = vpop.f32.mrb[17].mxu1 }
 0x40b   : > { %v2096_v58 = vadd.f32 %v2095_v45, %v2094_v52  ;;  %v2097_v46 = vpop.f32.mrb[18].mxu1 }
 0x40c   : > { %v2098_v5 = vpop.f32.mrb[19].mxu1 }
 0x40d   : > { %v1823_v8 = vadd.f32 %v2096_v58, %v1681_v49 }
 0x410   : > { %v1781_v54 = vpop.f32.mrb[0].mxu0 }
 0x411   : > { %v2111_v55 = vadd.f32 %v1781_v54, %v1681_v49  ;;  %v1783_v30 = vpop.f32.mrb[1].mxu0  ;;  %v1862_v61 = vpop.f32.mrb[20].mxu1 }
 0x412   : > { %v2112_v11 = vadd.f32 %v1783_v30, %v1681_v49  ;;  %v1863_v12 = vadd.f32 %v1862_v61, %v1823_v8  ;;  %v1785_v60 = vpop.f32.mrb[2].mxu0  ;;  %v2109_v59 = vpop.f32.mrb[21].mxu1 }
 0x413   : > { %v1892_v13 = vmul.f32 %v2111_v55, %v1890_v51  ;;  %v1786_v42 = vpop.f32.mrb[3].mxu0  ;;  %v1865_v7 = vpop.f32.mrb[22].mxu1 }
 0x414   : > { %v1893_v14 = vmul.f32 %v2112_v11, %v1890_v51  ;;  %v1894_v63 = vmul.f32 %v1890_v51, %v1863_v12  ;;  %v2110_v17 = vpop.f32.mrb[23].mxu1 }
 0x416   : > { %1901 = vrot.lane.b32.xlu0 %v1894_v63, %s2255_s19  ;;  %v1898_v6 = vcombine.low %v1892_v13, %v1893_v14 }
 0x418   : > { %1899 = vrot.lane.b32.xlu1 %v1898_v6, %s2255_s19 }
 0x488   : > { %v1902_v19 = vpop.permute.xlu0 %1901 }
 0x489   : > { %v1904_v2 = vrot.slane %v1902_v19, 4 }
 0x48a   : > { %v1900_v20 = vpop.permute.xlu1 %1899 }
 0x48b   : > { %v1903_v62 = vrot.slane %v1900_v20, 4 }
 0x48d   : > { %v1906_v16 = vsel %vm1905_vm13, %v1903_v62, %v1900_v20  ;;  %v1908_v24 = vsel %vm499_vm0, %v1903_v62, %v1904_v2 }
 0x48e   : > { %v1909_v21 = vsel %vm1905_vm13, %v1908_v24, %v1902_v19  ;;  %v1912_v25 = vadd.f32 %v1906_v16, %v1881_v18 }
 0x48f   : > { %v1913_v15 = vadd.f32 %v1909_v21, %v1882_v57 }
 0x490   : > { %1916 = vrot.lane.b32.xlu1 %v1912_v25, %s2251_s23 }
 0x491   : > { %1918 = vrot.lane.b32.xlu0 %v1913_v15, %s2251_s23 }
 0x502   : > { %v1917_v9 = vpop.permute.xlu1 %1916 }
 0x503   : > { %v1920_v26 = vrot.slane %v1917_v9, 4  ;;  %v1919_v27 = vpop.permute.xlu0 %1918 }
 0x504   : > { %v1921_v22 = vrot.slane %v1919_v27, 4 }
 0x506   : > { %v1922_v23 = vsel %vm499_vm0, %v1920_v26, %v1921_v22  ;;  %v1925_v47 = vsel %vm812_vm8, %v1919_v27, %v1921_v22 }
 0x507   : > { %v1924_v32 = vsel %vm812_vm8, %v1917_v9, %v1922_v23  ;;  %1929 = vst [vmem:[%s359_s24 + $0x8] sm:$0xf] %v1925_v47 }
 0x508   : > { %1928 = vst [vmem:[%s359_s24] sm:$0xff] %v1924_v32 }
 0x509 PF: > { %s18_s27 = sadd.s32 1, %s2241_s27  }
 0x50a   : > { %p15_p4 = scmp.ge.s32.totalorder %s18_s27, 4  }
 0x50c   :  { %17 = sbr.rel (!%p15_p4) target bundleno = 1 (0x1), region = 91 }

</bundles_post_ra>
